<compile_context>
chip_gen: v7x
topology: tpu7x:2x2x1
jax: 0.10.0
libtpu: 0.0.40
codegen_flags: <defaults>
</compile_context>

<pallas_src>
import functools

import jax
import jax.numpy as jnp
import numpy as np
from jax.experimental import pallas as pl
from jax.experimental.pallas import tpu as pltpu


# ----------------------------------------------------------------------------
# Fused kernel: one grid step = NB batch elements, everything stays in VMEM.
#
# Activation layout: channel-major (C, nb * S) where S = (Ho+2)*(Wo+2) is one
# zero-padded spatial plane flattened row-major.  Output plane position
# p = r*Wp + s at tap (kh, kw) reads input position p + (kh-1)*Wp + (kw-1);
# with a (Wp+1)-column guard on each side this is always a contiguous slice.
# Valid output columns only ever read their own sample's plane (whose halo is
# genuinely zero), so the single matmul per conv is exact; halo output columns
# are garbage and are sliced away by the wrapper.
# ----------------------------------------------------------------------------
def _se_block_kernel(*refs, nb, Ho, Wo, Cin, Cout, has_ds):
    if has_ds:
        (x_ref, w1_ref, b1_ref, w2_ref, b2_ref, wd_ref, bd_ref,
         sw1_ref, sb1_ref, sw2_ref, sb2_ref,
         mask_ref, pool_ref, gexp_ref,
         o_ref, p1_ref, p2_ref, ybuf_ref) = refs
    else:
        (x_ref, w1_ref, b1_ref, w2_ref, b2_ref,
         sw1_ref, sb1_ref, sw2_ref, sb2_ref,
         mask_ref, pool_ref, gexp_ref,
         o_ref, p1_ref, p2_ref, ybuf_ref) = refs
        wd_ref = bd_ref = None

    f32, bf16 = jnp.float32, jnp.bfloat16
    Hp, Wp = Ho + 2, Wo + 2
    S = Hp * Wp                    # one padded plane, flattened row-major
    G = Wp + 1                     # guard columns keeping every tap slice in-bounds
    NBS = nb * S

    xb = x_ref[0]                  # (Cin, NBS + 2G) bf16, channel-major flat layout

    # ---- conv1 (+folded BN1) + ReLU : ONE matmul, K = 9*Cin ------------------
    for t in range(9):
        start = (t // 3) * Wp + (t % 3)
        p1_ref[t * Cin:(t + 1) * Cin, :] = xb[:, start:start + NBS]
    y1 = jnp.dot(w1_ref[...], p1_ref[...], preferred_element_type=f32) + b1_ref[...]
    y1 = jnp.maximum(y1, 0.0) * mask_ref[...]       # zero each plane's 1-px halo

    # ---- conv2 input buffer: guarded, bf16 (only the tiny guards are zeroed) -
    ybuf_ref[:, 0:G] = jnp.zeros((Cout, G), bf16)
    ybuf_ref[:, G + NBS:G + NBS + G] = jnp.zeros((Cout, G), bf16)
    ybuf_ref[:, G:G + NBS] = y1.astype(bf16)

    # ---- conv2 (+folded BN2), no ReLU : ONE matmul, K = 9*Cout ---------------
    for t in range(9):
        start = (t // 3) * Wp + (t % 3)
        p2_ref[t * Cout:(t + 1) * Cout, :] = ybuf_ref[:, start:start + NBS]
    y2 = jnp.dot(w2_ref[...], p2_ref[...], preferred_element_type=f32) + b2_ref[...]

    # ---- residual: folded 1x1 conv + BN when Cin != Cout, else identity ------
    xc = xb[:, G:G + NBS]                           # center tap = the input itself
    if has_ds:
        res = jnp.dot(wd_ref[...], xc, preferred_element_type=f32) + bd_ref[...]
    else:
        res = xc.astype(f32)

    # ---- SE gate, computed for the whole NB-sample tile at once --------------
    pooled = jnp.dot(y2, pool_ref[...], preferred_element_type=f32)        # (Cout, nb)
    h = jnp.maximum(jnp.dot(sw1_ref[...], pooled, preferred_element_type=f32)
                    + sb1_ref[...], 0.0)                                   # (Cr, nb)
    gate = jax.nn.sigmoid(jnp.dot(sw2_ref[...], h, preferred_element_type=f32)
                          + sb2_ref[...])                                  # (Cout, nb)
    gfull = jnp.dot(gate, gexp_ref[...], preferred_element_type=f32)       # (Cout, NBS)

    # ---- gate * y2 + residual, final ReLU; store NCHW-ordered ----------------
    y = jnp.maximum(y2 * gfull + res, 0.0)                                 # (Cout, NBS)
    for b in range(nb):
        o_ref[b] = y[:, b * S:(b + 1) * S].astype(o_ref.dtype)


# ----------------------------------------------------------------------------
# BN folding + wrapper
# ----------------------------------------------------------------------------
def _fold_bn(w_oihw, bn, eps=1e-5):
    """conv weight (Cout,Cin,kh,kw) + BN -> (Cout, kh*kw*Cin) bf16, (Cout,1) f32 bias."""
    gamma, beta, mean, var = bn
    scale = gamma / jnp.sqrt(var + eps)
    bias = (beta - mean * scale).reshape(-1, 1).astype(jnp.float32)
    cout, cin, kh, kw = w_oihw.shape
    wf = w_oihw * scale[:, None, None, None]
    wmat = jnp.transpose(wf, (0, 2, 3, 1)).reshape(cout, kh * kw * cin)
    return wmat.astype(jnp.bfloat16), bias


def block_forward_pallas(x_nchw, p, stride=1, nb=None):
    if stride != 1:
        # TODO(synk): stride>1 needs strided tap selection (space-to-depth / DMA-side
        # subsampling); the default stride=1 block is what this kernel implements.
        raise NotImplementedError("this Pallas kernel implements the stride=1 block")
    N, Cin, H, W = x_nchw.shape
    Cout = p["w_conv1"].shape[0]
    has_ds = Cin != Cout
    Ho, Wo = H, W
    Hp, Wp = Ho + 2, Wo + 2
    S, G = Hp * Wp, Wp + 1

    if nb is None:
        nb = min(8, N)
    while N % nb:                   # largest divisor of N not exceeding the request
        nb -= 1
    ngrid = N // nb
    NBS = nb * S

    # channel-major, zero-padded, flattened bf16 input layout (one XLA prep pass,
    # half the DMA bytes of the previous f32 NHWC pad).
    xp = jnp.pad(x_nchw.astype(jnp.bfloat16), ((0, 0), (0, 0), (1, 1), (1, 1)))
    xp = xp.reshape(ngrid, nb, Cin, S).transpose(0, 2, 1, 3).reshape(ngrid, Cin, NBS)
    xflat = jnp.pad(xp, ((0, 0), (0, 0), (G, G)))                # (ngrid, Cin, NBS+2G)

    w1, b1 = _fold_bn(p["w_conv1"], p["bn1"])                    # (Cout, 9*Cin)
    w2, b2 = _fold_bn(p["w_conv2"], p["bn2"])                    # (Cout, 9*Cout)
    sw1t = jnp.asarray(p["se_w1"]).T.astype(jnp.float32)         # (Cr, Cout)
    sb1 = jnp.asarray(p["se_b1"]).reshape(-1, 1).astype(jnp.float32)
    sw2t = jnp.asarray(p["se_w2"]).T.astype(jnp.float32)         # (Cout, Cr)
    sb2 = jnp.asarray(p["se_b2"]).reshape(-1, 1).astype(jnp.float32)

    # structural constants: per-plane validity mask, SE pooling / gate-expansion mats
    valid = np.zeros((Hp, Wp), np.float32)
    valid[1:1 + Ho, 1:1 + Wo] = 1.0
    valid = valid.reshape(-1)
    mask = jnp.asarray(np.tile(valid, nb)[None, :])              # (1, NBS)
    pool_np = np.zeros((NBS, nb), np.float32)
    gexp_np = np.zeros((nb, NBS), np.float32)
    for b in range(nb):
        pool_np[b * S:(b + 1) * S, b] = valid / float(Ho * Wo)
        gexp_np[b, b * S:(b + 1) * S] = valid
    pool = jnp.asarray(pool_np)
    gexp = jnp.asarray(gexp_np)

    def full_spec(a):
        nd = a.ndim
        return pl.BlockSpec(tuple(a.shape), lambda g: (0,) * nd)

    in_specs = [pl.BlockSpec((1, Cin, NBS + 2 * G), lambda g: (g, 0, 0)),
                full_spec(w1), full_spec(b1), full_spec(w2), full_spec(b2)]
    args = [xflat, w1, b1, w2, b2]
    if has_ds:
        wd, bd = _fold_bn(p["w_ds"], p["bn_ds"])                 # (Cout, Cin), (Cout,1)
        in_specs += [full_spec(wd), full_spec(bd)]
        args += [wd, bd]
    in_specs += [full_spec(sw1t), full_spec(sb1), full_spec(sw2t), full_spec(sb2),
                 full_spec(mask), full_spec(pool), full_spec(gexp)]
    args += [sw1t, sb1, sw2t, sb2, mask, pool, gexp]

    kernel = functools.partial(_se_block_kernel, nb=nb, Ho=Ho, Wo=Wo,
                               Cin=Cin, Cout=Cout, has_ds=has_ds)

    out = pl.pallas_call(
        kernel,
        out_shape=jax.ShapeDtypeStruct((N, Cout, S), jnp.float32),
        grid_spec=pltpu.PrefetchScalarGridSpec(
            num_scalar_prefetch=0,
            grid=(ngrid,),
            in_specs=in_specs,
            out_specs=pl.BlockSpec((nb, Cout, S), lambda g: (g, 0, 0)),
            scratch_shapes=[pltpu.VMEM((9 * Cin, NBS), jnp.bfloat16),    # conv1 patch
                            pltpu.VMEM((9 * Cout, NBS), jnp.bfloat16),   # conv2 patch
                            pltpu.VMEM((Cout, NBS + 2 * G), jnp.bfloat16)]),  # y1 buf
        compiler_params=pltpu.CompilerParams(
            dimension_semantics=("parallel",),
            vmem_limit_bytes=48 * 1024 * 1024),   # explicit cap: safe on v7x's 64 MiB
    )(*args)

    # drop the 1-px halo columns and restore NCHW
    return out.reshape(N, Cout, Hp, Wp)[:, :, 1:1 + Ho, 1:1 + Wo]


# ----------------------------------------------------------------------------
# Pure-JAX reference mirroring the kernel's numerics (same BN folding, same
# bf16 rounding of MXU operands, f32 accumulation).
# ----------------------------------------------------------------------------
def block_forward_ref(x_nchw, p, stride=1):
    assert stride == 1
    Cout = p["w_conv1"].shape[0]
    Cin = x_nchw.shape[1]
    has_ds = Cin != Cout
    eps = 1e-5
    f32, bf16 = jnp.float32, jnp.bfloat16

    def bf(v):
        return v.astype(bf16).astype(f32)

    def fold(w, bn):
        gamma, beta, mean, var = bn
        scale = gamma / jnp.sqrt(var + eps)
        return bf(w * scale[:, None, None, None]), (beta - mean * scale).astype(f32)

    def conv(xv, wv, pad):
        return jax.lax.conv_general_dilated(
            xv, wv, (1, 1), pad, dimension_numbers=("NCHW", "OIHW", "NCHW"),
            precision=jax.lax.Precision.HIGHEST)

    xb = bf(x_nchw)
    w1, b1 = fold(p["w_conv1"], p["bn1"])
    w2, b2 = fold(p["w_conv2"], p["bn2"])

    y1 = jnp.maximum(conv(xb, w1, ((1, 1), (1, 1))) + b1.reshape(1, -1, 1, 1), 0.0)
    y2 = conv(bf(y1), w2, ((1, 1), (1, 1))) + b2.reshape(1, -1, 1, 1)

    if has_ds:
        wd, bd = fold(p["w_ds"], p["bn_ds"])
        res = conv(xb, wd, ((0, 0), (0, 0))) + bd.reshape(1, -1, 1, 1)
    else:
        res = xb

    pooled = y2.mean(axis=(2, 3))                                    # (N, Cout)
    h = jnp.maximum(
        jnp.dot(pooled, p["se_w1"], precision=jax.lax.Precision.HIGHEST) + p["se_b1"], 0.0)
    gate = jax.nn.sigmoid(
        jnp.dot(h, p["se_w2"], precision=jax.lax.Precision.HIGHEST) + p["se_b2"])
    return jnp.maximum(y2 * gate[:, :, None, None] + res, 0.0)       # NCHW


# ----------------------------------------------------------------------------
# main
# ----------------------------------------------------------------------------
if __name__ == "__main__":
    f32 = jnp.float32

    def make_params(key, inplanes, planes, reduction=16):
        cr = max(planes // reduction, 1)
        ks = jax.random.split(key, 12)

        def nrm(k, shape, s=0.1):
            return s * jax.random.normal(k, shape, f32)

        def bn(k):
            k1, k2, k3, k4 = jax.random.split(k, 4)
            return (1.0 + 0.1 * jax.random.normal(k1, (planes,), f32),
                    0.1 * jax.random.normal(k2, (planes,), f32),
                    0.1 * jax.random.normal(k3, (planes,), f32),
                    0.5 + jnp.abs(jax.random.normal(k4, (planes,), f32)))

        p = {"w_conv1": nrm(ks[0], (planes, inplanes, 3, 3)),
             "bn1": bn(ks[1]),
             "w_conv2": nrm(ks[2], (planes, planes, 3, 3)),
             "bn2": bn(ks[3]),
             "se_w1": nrm(ks[4], (planes, cr)),
             "se_b1": nrm(ks[5], (cr,)),
             "se_w2": nrm(ks[6], (cr, planes)),
             "se_b2": nrm(ks[7], (planes,))}
        if inplanes != planes:
            p["w_ds"] = nrm(ks[8], (planes, inplanes, 1, 1))
            p["bn_ds"] = bn(ks[9])
        return p

    k1, k2, k3, k4 = jax.random.split(jax.random.PRNGKey(0), 4)

    # config 1: downsample residual (inplanes != planes), 2 grid steps of NB=4 samples
    p_ds = make_params(k1, 16, 32)
    x_ds = jax.random.normal(k2, (8, 16, 8, 8), f32)
    out1 = jax.block_until_ready(block_forward_pallas(x_ds, p_ds, stride=1, nb=4))
    ref1 = jax.block_until_ready(block_forward_ref(x_ds, p_ds, stride=1))
    assert out1.shape == (8, 32, 8, 8), out1.shape
    d1 = float(jnp.max(jnp.abs(out1 - ref1)))
    assert np.allclose(np.asarray(out1), np.asarray(ref1), atol=1e-2, rtol=1e-2), \
        "downsample config mismatch, max abs diff = %g" % d1

    # config 2: identity residual (inplanes == planes), 2 grid steps of NB=2 samples
    p_id = make_params(k3, 32, 32)
    x_id = jax.random.normal(k4, (4, 32, 8, 8), f32)
    out2 = jax.block_until_ready(block_forward_pallas(x_id, p_id, stride=1, nb=2))
    ref2 = jax.block_until_ready(block_forward_ref(x_id, p_id, stride=1))
    assert out2.shape == (4, 32, 8, 8), out2.shape
    d2 = float(jnp.max(jnp.abs(out2 - ref2)))
    assert np.allclose(np.asarray(out2), np.asarray(ref2), atol=1e-2, rtol=1e-2), \
        "identity config mismatch, max abs diff = %g" % d2

    print("KERNEL_OK")
</pallas_src>

<mosaic_0001>
module attributes {stable_mosaic.version = 11 : i64} {
  func.func @_se_block_kernel(%arg0: i32, %arg1: memref<1x16x422xbf16, #tpu.memory_space<vmem>>, %arg2: memref<32x144xbf16, #tpu.memory_space<vmem>>, %arg3: memref<32x1xf32, #tpu.memory_space<vmem>>, %arg4: memref<32x288xbf16, #tpu.memory_space<vmem>>, %arg5: memref<32x1xf32, #tpu.memory_space<vmem>>, %arg6: memref<32x16xbf16, #tpu.memory_space<vmem>>, %arg7: memref<32x1xf32, #tpu.memory_space<vmem>>, %arg8: memref<2x32xf32, #tpu.memory_space<vmem>>, %arg9: memref<2x1xf32, #tpu.memory_space<vmem>>, %arg10: memref<32x2xf32, #tpu.memory_space<vmem>>, %arg11: memref<32x1xf32, #tpu.memory_space<vmem>>, %arg12: memref<1x400xf32, #tpu.memory_space<vmem>>, %arg13: memref<400x4xf32, #tpu.memory_space<vmem>>, %arg14: memref<4x400xf32, #tpu.memory_space<vmem>>, %arg15: memref<4x32x100xf32, #tpu.memory_space<vmem>>, %arg16: memref<144x400xbf16, #tpu.memory_space<vmem>>, %arg17: memref<288x400xbf16, #tpu.memory_space<vmem>>, %arg18: memref<32x422xbf16, #tpu.memory_space<vmem>>) attributes {dimension_semantics = [#tpu.dimension_semantics<parallel>], iteration_bounds = array<i64: 2>, scalar_prefetch = 0 : i64, scratch_operands = 3 : i64, tpu.core_type = #tpu.core_type<tc>, window_params = [{transform_indices = @transform_0, window_bounds = array<i64: 1, 16, 422>}, {pipeline_mode = #tpu.pipeline_mode<synchronous>, transform_indices = @transform_1, window_bounds = array<i64: 32, 144>}, {pipeline_mode = #tpu.pipeline_mode<synchronous>, transform_indices = @transform_2, window_bounds = array<i64: 32, 1>}, {pipeline_mode = #tpu.pipeline_mode<synchronous>, transform_indices = @transform_3, window_bounds = array<i64: 32, 288>}, {pipeline_mode = #tpu.pipeline_mode<synchronous>, transform_indices = @transform_4, window_bounds = array<i64: 32, 1>}, {pipeline_mode = #tpu.pipeline_mode<synchronous>, transform_indices = @transform_5, window_bounds = array<i64: 32, 16>}, {pipeline_mode = #tpu.pipeline_mode<synchronous>, transform_indices = @transform_6, window_bounds = array<i64: 32, 1>}, {pipeline_mode = #tpu.pipeline_mode<synchronous>, transform_indices = @transform_7, window_bounds = array<i64: 2, 32>}, {pipeline_mode = #tpu.pipeline_mode<synchronous>, transform_indices = @transform_8, window_bounds = array<i64: 2, 1>}, {pipeline_mode = #tpu.pipeline_mode<synchronous>, transform_indices = @transform_9, window_bounds = array<i64: 32, 2>}, {pipeline_mode = #tpu.pipeline_mode<synchronous>, transform_indices = @transform_10, window_bounds = array<i64: 32, 1>}, {pipeline_mode = #tpu.pipeline_mode<synchronous>, transform_indices = @transform_11, window_bounds = array<i64: 1, 400>}, {pipeline_mode = #tpu.pipeline_mode<synchronous>, transform_indices = @transform_12, window_bounds = array<i64: 400, 4>}, {pipeline_mode = #tpu.pipeline_mode<synchronous>, transform_indices = @transform_13, window_bounds = array<i64: 4, 400>}, {transform_indices = @transform_14, window_bounds = array<i64: 4, 32, 100>}]} {
    %c0 = arith.constant 0 : index
    %c0_0 = arith.constant 0 : index
    %c0_1 = arith.constant 0 : index
    %0 = vector.load %arg1[%c0, %c0_0, %c0_1] : memref<1x16x422xbf16, #tpu.memory_space<vmem>>, vector<1x16x422xbf16>
    %1 = vector.shape_cast %0 : vector<1x16x422xbf16> to vector<16x422xbf16>
    %2 = vector.extract_strided_slice %1 {offsets = [0, 0], sizes = [16, 400], strides = [1, 1]} : vector<16x422xbf16> to vector<16x400xbf16>
    %c0_2 = arith.constant 0 : index
    %c0_3 = arith.constant 0 : index
    %3 = vector.load %arg16[%c0_2, %c0_3] : memref<144x400xbf16, #tpu.memory_space<vmem>>, vector<16x400xbf16>
    tpu.vector_store %arg16[%c0_2, %c0_3], %2 {strides = array<i32>} : memref<144x400xbf16, #tpu.memory_space<vmem>>, vector<16x400xbf16>,
    %4 = vector.extract_strided_slice %1 {offsets = [0, 1], sizes = [16, 400], strides = [1, 1]} : vector<16x422xbf16> to vector<16x400xbf16>
    %c16 = arith.constant 16 : index
    %c0_4 = arith.constant 0 : index
    %5 = vector.load %arg16[%c16, %c0_4] : memref<144x400xbf16, #tpu.memory_space<vmem>>, vector<16x400xbf16>
    tpu.vector_store %arg16[%c16, %c0_4], %4 {strides = array<i32>} : memref<144x400xbf16, #tpu.memory_space<vmem>>, vector<16x400xbf16>,
    %6 = vector.extract_strided_slice %1 {offsets = [0, 2], sizes = [16, 400], strides = [1, 1]} : vector<16x422xbf16> to vector<16x400xbf16>
    %c32 = arith.constant 32 : index
    %c0_5 = arith.constant 0 : index
    %7 = vector.load %arg16[%c32, %c0_5] : memref<144x400xbf16, #tpu.memory_space<vmem>>, vector<16x400xbf16>
    tpu.vector_store %arg16[%c32, %c0_5], %6 {strides = array<i32>} : memref<144x400xbf16, #tpu.memory_space<vmem>>, vector<16x400xbf16>,
    %8 = vector.extract_strided_slice %1 {offsets = [0, 10], sizes = [16, 400], strides = [1, 1]} : vector<16x422xbf16> to vector<16x400xbf16>
    %c48 = arith.constant 48 : index
    %c0_6 = arith.constant 0 : index
    %9 = vector.load %arg16[%c48, %c0_6] : memref<144x400xbf16, #tpu.memory_space<vmem>>, vector<16x400xbf16>
    tpu.vector_store %arg16[%c48, %c0_6], %8 {strides = array<i32>} : memref<144x400xbf16, #tpu.memory_space<vmem>>, vector<16x400xbf16>,
    %10 = vector.extract_strided_slice %1 {offsets = [0, 11], sizes = [16, 400], strides = [1, 1]} : vector<16x422xbf16> to vector<16x400xbf16>
    %c64 = arith.constant 64 : index
    %c0_7 = arith.constant 0 : index
    %11 = vector.load %arg16[%c64, %c0_7] : memref<144x400xbf16, #tpu.memory_space<vmem>>, vector<16x400xbf16>
    tpu.vector_store %arg16[%c64, %c0_7], %10 {strides = array<i32>} : memref<144x400xbf16, #tpu.memory_space<vmem>>, vector<16x400xbf16>,
    %12 = vector.extract_strided_slice %1 {offsets = [0, 12], sizes = [16, 400], strides = [1, 1]} : vector<16x422xbf16> to vector<16x400xbf16>
    %c80 = arith.constant 80 : index
    %c0_8 = arith.constant 0 : index
    %13 = vector.load %arg16[%c80, %c0_8] : memref<144x400xbf16, #tpu.memory_space<vmem>>, vector<16x400xbf16>
    tpu.vector_store %arg16[%c80, %c0_8], %12 {strides = array<i32>} : memref<144x400xbf16, #tpu.memory_space<vmem>>, vector<16x400xbf16>,
    %14 = vector.extract_strided_slice %1 {offsets = [0, 20], sizes = [16, 400], strides = [1, 1]} : vector<16x422xbf16> to vector<16x400xbf16>
    %c96 = arith.constant 96 : index
    %c0_9 = arith.constant 0 : index
    %15 = vector.load %arg16[%c96, %c0_9] : memref<144x400xbf16, #tpu.memory_space<vmem>>, vector<16x400xbf16>
    tpu.vector_store %arg16[%c96, %c0_9], %14 {strides = array<i32>} : memref<144x400xbf16, #tpu.memory_space<vmem>>, vector<16x400xbf16>,
    %16 = vector.extract_strided_slice %1 {offsets = [0, 21], sizes = [16, 400], strides = [1, 1]} : vector<16x422xbf16> to vector<16x400xbf16>
    %c112 = arith.constant 112 : index
    %c0_10 = arith.constant 0 : index
    %17 = vector.load %arg16[%c112, %c0_10] : memref<144x400xbf16, #tpu.memory_space<vmem>>, vector<16x400xbf16>
    tpu.vector_store %arg16[%c112, %c0_10], %16 {strides = array<i32>} : memref<144x400xbf16, #tpu.memory_space<vmem>>, vector<16x400xbf16>,
    %18 = vector.extract_strided_slice %1 {offsets = [0, 22], sizes = [16, 400], strides = [1, 1]} : vector<16x422xbf16> to vector<16x400xbf16>
    %c128 = arith.constant 128 : index
    %c0_11 = arith.constant 0 : index
    %19 = vector.load %arg16[%c128, %c0_11] : memref<144x400xbf16, #tpu.memory_space<vmem>>, vector<16x400xbf16>
    tpu.vector_store %arg16[%c128, %c0_11], %18 {strides = array<i32>} : memref<144x400xbf16, #tpu.memory_space<vmem>>, vector<16x400xbf16>,
    %c0_12 = arith.constant 0 : index
    %c0_13 = arith.constant 0 : index
    %20 = vector.load %arg2[%c0_12, %c0_13] : memref<32x144xbf16, #tpu.memory_space<vmem>>, vector<32x144xbf16>
    %c0_14 = arith.constant 0 : index
    %c0_15 = arith.constant 0 : index
    %21 = vector.load %arg16[%c0_14, %c0_15] : memref<144x400xbf16, #tpu.memory_space<vmem>>, vector<144x400xbf16>
    %cst = arith.constant dense<0.000000e+00> : vector<32x400xf32>
    %22 = tpu.matmul %20, %21, %cst {dimension_numbers = #tpu.dot_dimension_numbers<[1], [0], [0], [1], [0, 0, 1, 1], [], []>} : vector<32x144xbf16>, vector<144x400xbf16>, vector<32x400xf32> -> vector<32x400xf32>
    %c0_16 = arith.constant 0 : index
    %c0_17 = arith.constant 0 : index
    %23 = vector.load %arg3[%c0_16, %c0_17] : memref<32x1xf32, #tpu.memory_space<vmem>>, vector<32x1xf32>
    %24 = vector.broadcast %23 : vector<32x1xf32> to vector<32x400xf32>
    %25 = arith.addf %22, %24 : vector<32x400xf32>
    %cst_18 = arith.constant 0.000000e+00 : f32
    %26 = vector.broadcast %cst_18 : f32 to vector<32x400xf32>
    %27 = arith.maximumf %25, %26 : vector<32x400xf32>
    %c0_19 = arith.constant 0 : index
    %c0_20 = arith.constant 0 : index
    %28 = vector.load %arg12[%c0_19, %c0_20] : memref<1x400xf32, #tpu.memory_space<vmem>>, vector<1x400xf32>
    %29 = vector.broadcast %28 : vector<1x400xf32> to vector<32x400xf32>
    %30 = arith.mulf %27, %29 : vector<32x400xf32>
    %cst_21 = arith.constant 0.000000e+00 : bf16
    %31 = vector.broadcast %cst_21 : bf16 to vector<32x11xbf16>
    %c0_22 = arith.constant 0 : index
    %c0_23 = arith.constant 0 : index
    %32 = vector.load %arg18[%c0_22, %c0_23] : memref<32x422xbf16, #tpu.memory_space<vmem>>, vector<32x11xbf16>
    tpu.vector_store %arg18[%c0_22, %c0_23], %31 {strides = array<i32>} : memref<32x422xbf16, #tpu.memory_space<vmem>>, vector<32x11xbf16>,
    %cst_24 = arith.constant 0.000000e+00 : bf16
    %33 = vector.broadcast %cst_24 : bf16 to vector<32x11xbf16>
    %c0_25 = arith.constant 0 : index
    %c411 = arith.constant 411 : index
    %34 = vector.load %arg18[%c0_25, %c411] : memref<32x422xbf16, #tpu.memory_space<vmem>>, vector<32x11xbf16>
    tpu.vector_store %arg18[%c0_25, %c411], %33 {strides = array<i32>} : memref<32x422xbf16, #tpu.memory_space<vmem>>, vector<32x11xbf16>,
    %35 = arith.truncf %30 : vector<32x400xf32> to vector<32x400xbf16>
    %c0_26 = arith.constant 0 : index
    %c11 = arith.constant 11 : index
    %36 = vector.load %arg18[%c0_26, %c11] : memref<32x422xbf16, #tpu.memory_space<vmem>>, vector<32x400xbf16>
    tpu.vector_store %arg18[%c0_26, %c11], %35 {strides = array<i32>} : memref<32x422xbf16, #tpu.memory_space<vmem>>, vector<32x400xbf16>,
    %c0_27 = arith.constant 0 : index
    %c0_28 = arith.constant 0 : index
    %37 = vector.load %arg18[%c0_27, %c0_28] : memref<32x422xbf16, #tpu.memory_space<vmem>>, vector<32x400xbf16>
    %c0_29 = arith.constant 0 : index
    %c0_30 = arith.constant 0 : index
    %38 = vector.load %arg17[%c0_29, %c0_30] : memref<288x400xbf16, #tpu.memory_space<vmem>>, vector<32x400xbf16>
    tpu.vector_store %arg17[%c0_29, %c0_30], %37 {strides = array<i32>} : memref<288x400xbf16, #tpu.memory_space<vmem>>, vector<32x400xbf16>,
    %c0_31 = arith.constant 0 : index
    %c1 = arith.constant 1 : index
    %39 = vector.load %arg18[%c0_31, %c1] : memref<32x422xbf16, #tpu.memory_space<vmem>>, vector<32x400xbf16>
    %c32_32 = arith.constant 32 : index
    %c0_33 = arith.constant 0 : index
    %40 = vector.load %arg17[%c32_32, %c0_33] : memref<288x400xbf16, #tpu.memory_space<vmem>>, vector<32x400xbf16>
    tpu.vector_store %arg17[%c32_32, %c0_33], %39 {strides = array<i32>} : memref<288x400xbf16, #tpu.memory_space<vmem>>, vector<32x400xbf16>,
    %c0_34 = arith.constant 0 : index
    %c2 = arith.constant 2 : index
    %41 = vector.load %arg18[%c0_34, %c2] : memref<32x422xbf16, #tpu.memory_space<vmem>>, vector<32x400xbf16>
    %c64_35 = arith.constant 64 : index
    %c0_36 = arith.constant 0 : index
    %42 = vector.load %arg17[%c64_35, %c0_36] : memref<288x400xbf16, #tpu.memory_space<vmem>>, vector<32x400xbf16>
    tpu.vector_store %arg17[%c64_35, %c0_36], %41 {strides = array<i32>} : memref<288x400xbf16, #tpu.memory_space<vmem>>, vector<32x400xbf16>,
    %c0_37 = arith.constant 0 : index
    %c10 = arith.constant 10 : index
    %43 = vector.load %arg18[%c0_37, %c10] : memref<32x422xbf16, #tpu.memory_space<vmem>>, vector<32x400xbf16>
    %c96_38 = arith.constant 96 : index
    %c0_39 = arith.constant 0 : index
    %44 = vector.load %arg17[%c96_38, %c0_39] : memref<288x400xbf16, #tpu.memory_space<vmem>>, vector<32x400xbf16>
    tpu.vector_store %arg17[%c96_38, %c0_39], %43 {strides = array<i32>} : memref<288x400xbf16, #tpu.memory_space<vmem>>, vector<32x400xbf16>,
    %c0_40 = arith.constant 0 : index
    %c11_41 = arith.constant 11 : index
    %45 = vector.load %arg18[%c0_40, %c11_41] : memref<32x422xbf16, #tpu.memory_space<vmem>>, vector<32x400xbf16>
    %c128_42 = arith.constant 128 : index
    %c0_43 = arith.constant 0 : index
    %46 = vector.load %arg17[%c128_42, %c0_43] : memref<288x400xbf16, #tpu.memory_space<vmem>>, vector<32x400xbf16>
    tpu.vector_store %arg17[%c128_42, %c0_43], %45 {strides = array<i32>} : memref<288x400xbf16, #tpu.memory_space<vmem>>, vector<32x400xbf16>,
    %c0_44 = arith.constant 0 : index
    %c12 = arith.constant 12 : index
    %47 = vector.load %arg18[%c0_44, %c12] : memref<32x422xbf16, #tpu.memory_space<vmem>>, vector<32x400xbf16>
    %c160 = arith.constant 160 : index
    %c0_45 = arith.constant 0 : index
    %48 = vector.load %arg17[%c160, %c0_45] : memref<288x400xbf16, #tpu.memory_space<vmem>>, vector<32x400xbf16>
    tpu.vector_store %arg17[%c160, %c0_45], %47 {strides = array<i32>} : memref<288x400xbf16, #tpu.memory_space<vmem>>, vector<32x400xbf16>,
    %c0_46 = arith.constant 0 : index
    %c20 = arith.constant 20 : index
    %49 = vector.load %arg18[%c0_46, %c20] : memref<32x422xbf16, #tpu.memory_space<vmem>>, vector<32x400xbf16>
    %c192 = arith.constant 192 : index
    %c0_47 = arith.constant 0 : index
    %50 = vector.load %arg17[%c192, %c0_47] : memref<288x400xbf16, #tpu.memory_space<vmem>>, vector<32x400xbf16>
    tpu.vector_store %arg17[%c192, %c0_47], %49 {strides = array<i32>} : memref<288x400xbf16, #tpu.memory_space<vmem>>, vector<32x400xbf16>,
    %c0_48 = arith.constant 0 : index
    %c21 = arith.constant 21 : index
    %51 = vector.load %arg18[%c0_48, %c21] : memref<32x422xbf16, #tpu.memory_space<vmem>>, vector<32x400xbf16>
    %c224 = arith.constant 224 : index
    %c0_49 = arith.constant 0 : index
    %52 = vector.load %arg17[%c224, %c0_49] : memref<288x400xbf16, #tpu.memory_space<vmem>>, vector<32x400xbf16>
    tpu.vector_store %arg17[%c224, %c0_49], %51 {strides = array<i32>} : memref<288x400xbf16, #tpu.memory_space<vmem>>, vector<32x400xbf16>,
    %c0_50 = arith.constant 0 : index
    %c22 = arith.constant 22 : index
    %53 = vector.load %arg18[%c0_50, %c22] : memref<32x422xbf16, #tpu.memory_space<vmem>>, vector<32x400xbf16>
    %c256 = arith.constant 256 : index
    %c0_51 = arith.constant 0 : index
    %54 = vector.load %arg17[%c256, %c0_51] : memref<288x400xbf16, #tpu.memory_space<vmem>>, vector<32x400xbf16>
    tpu.vector_store %arg17[%c256, %c0_51], %53 {strides = array<i32>} : memref<288x400xbf16, #tpu.memory_space<vmem>>, vector<32x400xbf16>,
    %c0_52 = arith.constant 0 : index
    %c0_53 = arith.constant 0 : index
    %55 = vector.load %arg4[%c0_52, %c0_53] : memref<32x288xbf16, #tpu.memory_space<vmem>>, vector<32x288xbf16>
    %c0_54 = arith.constant 0 : index
    %c0_55 = arith.constant 0 : index
    %56 = vector.load %arg17[%c0_54, %c0_55] : memref<288x400xbf16, #tpu.memory_space<vmem>>, vector<288x400xbf16>
    %cst_56 = arith.constant dense<0.000000e+00> : vector<32x400xf32>
    %57 = tpu.matmul %55, %56, %cst_56 {dimension_numbers = #tpu.dot_dimension_numbers<[1], [0], [0], [1], [0, 0, 1, 1], [], []>} : vector<32x288xbf16>, vector<288x400xbf16>, vector<32x400xf32> -> vector<32x400xf32>
    %c0_57 = arith.constant 0 : index
    %c0_58 = arith.constant 0 : index
    %58 = vector.load %arg5[%c0_57, %c0_58] : memref<32x1xf32, #tpu.memory_space<vmem>>, vector<32x1xf32>
    %59 = vector.broadcast %58 : vector<32x1xf32> to vector<32x400xf32>
    %60 = arith.addf %57, %59 : vector<32x400xf32>
    %61 = vector.extract_strided_slice %1 {offsets = [0, 11], sizes = [16, 400], strides = [1, 1]} : vector<16x422xbf16> to vector<16x400xbf16>
    %c0_59 = arith.constant 0 : index
    %c0_60 = arith.constant 0 : index
    %62 = vector.load %arg6[%c0_59, %c0_60] : memref<32x16xbf16, #tpu.memory_space<vmem>>, vector<32x16xbf16>
    %cst_61 = arith.constant dense<0.000000e+00> : vector<32x400xf32>
    %63 = tpu.matmul %62, %61, %cst_61 {dimension_numbers = #tpu.dot_dimension_numbers<[1], [0], [0], [1], [0, 0, 1, 1], [], []>} : vector<32x16xbf16>, vector<16x400xbf16>, vector<32x400xf32> -> vector<32x400xf32>
    %c0_62 = arith.constant 0 : index
    %c0_63 = arith.constant 0 : index
    %64 = vector.load %arg7[%c0_62, %c0_63] : memref<32x1xf32, #tpu.memory_space<vmem>>, vector<32x1xf32>
    %65 = vector.broadcast %64 : vector<32x1xf32> to vector<32x400xf32>
    %66 = arith.addf %63, %65 : vector<32x400xf32>
    %c0_64 = arith.constant 0 : index
    %c0_65 = arith.constant 0 : index
    %67 = vector.load %arg13[%c0_64, %c0_65] : memref<400x4xf32, #tpu.memory_space<vmem>>, vector<400x4xf32>
    %cst_66 = arith.constant dense<0.000000e+00> : vector<32x4xf32>
    %68 = tpu.matmul %60, %67, %cst_66 {dimension_numbers = #tpu.dot_dimension_numbers<[1], [0], [0], [1], [0, 0, 1, 1], [], []>} : vector<32x400xf32>, vector<400x4xf32>, vector<32x4xf32> -> vector<32x4xf32>
    %c0_67 = arith.constant 0 : index
    %c0_68 = arith.constant 0 : index
    %69 = vector.load %arg8[%c0_67, %c0_68] : memref<2x32xf32, #tpu.memory_space<vmem>>, vector<2x32xf32>
    %cst_69 = arith.constant dense<0.000000e+00> : vector<2x4xf32>
    %70 = tpu.matmul %69, %68, %cst_69 {dimension_numbers = #tpu.dot_dimension_numbers<[1], [0], [0], [1], [0, 0, 1, 1], [], []>} : vector<2x32xf32>, vector<32x4xf32>, vector<2x4xf32> -> vector<2x4xf32>
    %c0_70 = arith.constant 0 : index
    %c0_71 = arith.constant 0 : index
    %71 = vector.load %arg9[%c0_70, %c0_71] : memref<2x1xf32, #tpu.memory_space<vmem>>, vector<2x1xf32>
    %72 = vector.broadcast %71 : vector<2x1xf32> to vector<2x4xf32>
    %73 = arith.addf %70, %72 : vector<2x4xf32>
    %cst_72 = arith.constant 0.000000e+00 : f32
    %74 = vector.broadcast %cst_72 : f32 to vector<2x4xf32>
    %75 = arith.maximumf %73, %74 : vector<2x4xf32>
    %c0_73 = arith.constant 0 : index
    %c0_74 = arith.constant 0 : index
    %76 = vector.load %arg10[%c0_73, %c0_74] : memref<32x2xf32, #tpu.memory_space<vmem>>, vector<32x2xf32>
    %cst_75 = arith.constant dense<0.000000e+00> : vector<32x4xf32>
    %77 = tpu.matmul %76, %75, %cst_75 {dimension_numbers = #tpu.dot_dimension_numbers<[1], [0], [0], [1], [0, 0, 1, 1], [], []>} : vector<32x2xf32>, vector<2x4xf32>, vector<32x4xf32> -> vector<32x4xf32>
    %c0_76 = arith.constant 0 : index
    %c0_77 = arith.constant 0 : index
    %78 = vector.load %arg11[%c0_76, %c0_77] : memref<32x1xf32, #tpu.memory_space<vmem>>, vector<32x1xf32>
    %79 = vector.broadcast %78 : vector<32x1xf32> to vector<32x4xf32>
    %80 = arith.addf %77, %79 : vector<32x4xf32>
    %81 = arith.negf %80 : vector<32x4xf32>
    %82 = math.exp %81 : vector<32x4xf32>
    %cst_78 = arith.constant 1.000000e+00 : f32
    %83 = vector.broadcast %cst_78 : f32 to vector<32x4xf32>
    %84 = arith.addf %83, %82 : vector<32x4xf32>
    %85 = arith.divf %83, %84 : vector<32x4xf32>
    %c0_79 = arith.constant 0 : index
    %c0_80 = arith.constant 0 : index
    %86 = vector.load %arg14[%c0_79, %c0_80] : memref<4x400xf32, #tpu.memory_space<vmem>>, vector<4x400xf32>
    %cst_81 = arith.constant dense<0.000000e+00> : vector<32x400xf32>
    %87 = tpu.matmul %85, %86, %cst_81 {dimension_numbers = #tpu.dot_dimension_numbers<[1], [0], [0], [1], [0, 0, 1, 1], [], []>} : vector<32x4xf32>, vector<4x400xf32>, vector<32x400xf32> -> vector<32x400xf32>
    %88 = arith.mulf %60, %87 : vector<32x400xf32>
    %89 = arith.addf %88, %66 : vector<32x400xf32>
    %cst_82 = arith.constant 0.000000e+00 : f32
    %90 = vector.broadcast %cst_82 : f32 to vector<32x400xf32>
    %91 = arith.maximumf %89, %90 : vector<32x400xf32>
    %92 = vector.extract_strided_slice %91 {offsets = [0, 0], sizes = [32, 100], strides = [1, 1]} : vector<32x400xf32> to vector<32x100xf32>
    %c0_83 = arith.constant 0 : index
    %c0_84 = arith.constant 0 : index
    %c0_85 = arith.constant 0 : index
    %93 = vector.load %arg15[%c0_83, %c0_84, %c0_85] : memref<4x32x100xf32, #tpu.memory_space<vmem>>, vector<1x32x100xf32>
    %94 = vector.shape_cast %93 : vector<1x32x100xf32> to vector<32x100xf32>
    %95 = vector.shape_cast %92 : vector<32x100xf32> to vector<1x32x100xf32>
    tpu.vector_store %arg15[%c0_83, %c0_84, %c0_85], %95 {strides = array<i32>} : memref<4x32x100xf32, #tpu.memory_space<vmem>>, vector<1x32x100xf32>,
    %96 = vector.extract_strided_slice %91 {offsets = [0, 100], sizes = [32, 100], strides = [1, 1]} : vector<32x400xf32> to vector<32x100xf32>
    %c1_86 = arith.constant 1 : index
    %c0_87 = arith.constant 0 : index
    %c0_88 = arith.constant 0 : index
    %97 = vector.load %arg15[%c1_86, %c0_87, %c0_88] : memref<4x32x100xf32, #tpu.memory_space<vmem>>, vector<1x32x100xf32>
    %98 = vector.shape_cast %97 : vector<1x32x100xf32> to vector<32x100xf32>
    %99 = vector.shape_cast %96 : vector<32x100xf32> to vector<1x32x100xf32>
    tpu.vector_store %arg15[%c1_86, %c0_87, %c0_88], %99 {strides = array<i32>} : memref<4x32x100xf32, #tpu.memory_space<vmem>>, vector<1x32x100xf32>,
    %100 = vector.extract_strided_slice %91 {offsets = [0, 200], sizes = [32, 100], strides = [1, 1]} : vector<32x400xf32> to vector<32x100xf32>
    %c2_89 = arith.constant 2 : index
    %c0_90 = arith.constant 0 : index
    %c0_91 = arith.constant 0 : index
    %101 = vector.load %arg15[%c2_89, %c0_90, %c0_91] : memref<4x32x100xf32, #tpu.memory_space<vmem>>, vector<1x32x100xf32>
    %102 = vector.shape_cast %101 : vector<1x32x100xf32> to vector<32x100xf32>
    %103 = vector.shape_cast %100 : vector<32x100xf32> to vector<1x32x100xf32>
    tpu.vector_store %arg15[%c2_89, %c0_90, %c0_91], %103 {strides = array<i32>} : memref<4x32x100xf32, #tpu.memory_space<vmem>>, vector<1x32x100xf32>,
    %104 = vector.extract_strided_slice %91 {offsets = [0, 300], sizes = [32, 100], strides = [1, 1]} : vector<32x400xf32> to vector<32x100xf32>
    %c3 = arith.constant 3 : index
    %c0_92 = arith.constant 0 : index
    %c0_93 = arith.constant 0 : index
    %105 = vector.load %arg15[%c3, %c0_92, %c0_93] : memref<4x32x100xf32, #tpu.memory_space<vmem>>, vector<1x32x100xf32>
    %106 = vector.shape_cast %105 : vector<1x32x100xf32> to vector<32x100xf32>
    %107 = vector.shape_cast %104 : vector<32x100xf32> to vector<1x32x100xf32>
    tpu.vector_store %arg15[%c3, %c0_92, %c0_93], %107 {strides = array<i32>} : memref<4x32x100xf32, #tpu.memory_space<vmem>>, vector<1x32x100xf32>,
    return
  }
  func.func @transform_0(%arg0: i32) -> (i32, i32, i32) {
    %c0_i32 = arith.constant 0 : i32
    %c0_i32_0 = arith.constant 0 : i32
    %c0_i32_1 = arith.constant 0 : i32
    return %arg0, %c0_i32, %c0_i32_0 : i32, i32, i32
  }
  func.func @transform_1(%arg0: i32) -> (i32, i32) {
    %c0_i32 = arith.constant 0 : i32
    %c0_i32_0 = arith.constant 0 : i32
    %c0_i32_1 = arith.constant 0 : i32
    return %c0_i32, %c0_i32_0 : i32, i32
  }
  func.func @transform_2(%arg0: i32) -> (i32, i32) {
    %c0_i32 = arith.constant 0 : i32
    %c0_i32_0 = arith.constant 0 : i32
    %c0_i32_1 = arith.constant 0 : i32
    return %c0_i32, %c0_i32_0 : i32, i32
  }
  func.func @transform_3(%arg0: i32) -> (i32, i32) {
    %c0_i32 = arith.constant 0 : i32
    %c0_i32_0 = arith.constant 0 : i32
    %c0_i32_1 = arith.constant 0 : i32
    return %c0_i32, %c0_i32_0 : i32, i32
  }
  func.func @transform_4(%arg0: i32) -> (i32, i32) {
    %c0_i32 = arith.constant 0 : i32
    %c0_i32_0 = arith.constant 0 : i32
    %c0_i32_1 = arith.constant 0 : i32
    return %c0_i32, %c0_i32_0 : i32, i32
  }
  func.func @transform_5(%arg0: i32) -> (i32, i32) {
    %c0_i32 = arith.constant 0 : i32
    %c0_i32_0 = arith.constant 0 : i32
    %c0_i32_1 = arith.constant 0 : i32
    return %c0_i32, %c0_i32_0 : i32, i32
  }
  func.func @transform_6(%arg0: i32) -> (i32, i32) {
    %c0_i32 = arith.constant 0 : i32
    %c0_i32_0 = arith.constant 0 : i32
    %c0_i32_1 = arith.constant 0 : i32
    return %c0_i32, %c0_i32_0 : i32, i32
  }
  func.func @transform_7(%arg0: i32) -> (i32, i32) {
    %c0_i32 = arith.constant 0 : i32
    %c0_i32_0 = arith.constant 0 : i32
    %c0_i32_1 = arith.constant 0 : i32
    return %c0_i32, %c0_i32_0 : i32, i32
  }
  func.func @transform_8(%arg0: i32) -> (i32, i32) {
    %c0_i32 = arith.constant 0 : i32
    %c0_i32_0 = arith.constant 0 : i32
    %c0_i32_1 = arith.constant 0 : i32
    return %c0_i32, %c0_i32_0 : i32, i32
  }
  func.func @transform_9(%arg0: i32) -> (i32, i32) {
    %c0_i32 = arith.constant 0 : i32
    %c0_i32_0 = arith.constant 0 : i32
    %c0_i32_1 = arith.constant 0 : i32
    return %c0_i32, %c0_i32_0 : i32, i32
  }
  func.func @transform_10(%arg0: i32) -> (i32, i32) {
    %c0_i32 = arith.constant 0 : i32
    %c0_i32_0 = arith.constant 0 : i32
    %c0_i32_1 = arith.constant 0 : i32
    return %c0_i32, %c0_i32_0 : i32, i32
  }
  func.func @transform_11(%arg0: i32) -> (i32, i32) {
    %c0_i32 = arith.constant 0 : i32
    %c0_i32_0 = arith.constant 0 : i32
    %c0_i32_1 = arith.constant 0 : i32
    return %c0_i32, %c0_i32_0 : i32, i32
  }
  func.func @transform_12(%arg0: i32) -> (i32, i32) {
    %c0_i32 = arith.constant 0 : i32
    %c0_i32_0 = arith.constant 0 : i32
    %c0_i32_1 = arith.constant 0 : i32
    return %c0_i32, %c0_i32_0 : i32, i32
  }
  func.func @transform_13(%arg0: i32) -> (i32, i32) {
    %c0_i32 = arith.constant 0 : i32
    %c0_i32_0 = arith.constant 0 : i32
    %c0_i32_1 = arith.constant 0 : i32
    return %c0_i32, %c0_i32_0 : i32, i32
  }
  func.func @transform_14(%arg0: i32) -> (i32, i32, i32) {
    %c0_i32 = arith.constant 0 : i32
    %c0_i32_0 = arith.constant 0 : i32
    %c0_i32_1 = arith.constant 0 : i32
    return %arg0, %c0_i32, %c0_i32_0 : i32, i32, i32
  }
}

</mosaic_0001>

<bundles_post_ra>
// kernel: tpu_custom_call.1
= control target key start
LH: loop header
LB: loop body
LE: loop exit
PB: predicated region body
PF: predicated region fallthrough
CT: control target
= control target key end

     0   :  { %s4300_s0 = inlined_call_operand.vmem [shape: bf16[2,16,422], index: 0, kind: input, shape index: {}]   ;;  %s4301_s1 = inlined_call_operand.vmem [shape: bf16[32,144], index: 1, kind: input, shape index: {}]   ;;  %s4302_s2 = inlined_call_operand.vmem [shape: f32[32,1], index: 2, kind: input, shape index: {}]   ;;  %s4303_s3 = inlined_call_operand.vmem [shape: bf16[32,288], index: 3, kind: input, shape index: {}]   ;;  %s4304_s4 = inlined_call_operand.vmem [shape: f32[32,1], index: 4, kind: input, shape index: {}]   ;;  %s4305_s5 = inlined_call_operand.vmem [shape: bf16[32,16], index: 5, kind: input, shape index: {}]   ;;  %s4306_s6 = inlined_call_operand.vmem [shape: f32[32,1], index: 6, kind: input, shape index: {}]   ;;  %s4307_s7 = inlined_call_operand.vmem [shape: f32[2,32], index: 7, kind: input, shape index: {}]   ;;  %s4308_s8 = inlined_call_operand.vmem [shape: f32[2,1], index: 8, kind: input, shape index: {}]   ;;  %s4309_s9 = inlined_call_operand.vmem [shape: f32[32,2], index: 9, kind: input, shape index: {}]   ;;  %s4310_s10 = inlined_call_operand.vmem [shape: f32[32,1], index: 10, kind: input, shape index: {}]   ;;  %s4311_s11 = inlined_call_operand.vmem [shape: f32[1,400], index: 11, kind: input, shape index: {}]   ;;  %s4312_s12 = inlined_call_operand.vmem [shape: f32[400,4], index: 12, kind: input, shape index: {}]   ;;  %s4313_s13 = inlined_call_operand.vmem [shape: f32[4,400], index: 13, kind: input, shape index: {}]   ;;  %s4314_s14 = inlined_call_operand.hbm [shape: f32[8,32,100], index: 14, kind: output, shape index: {}]  }
   0x1   :  { %4331 = sst [smem:[#allocation8_spill]] %s4300_s0 }
   0x2   :  { %4332 = sst [smem:[#allocation9_spill]] %s4301_s1 }
   0x3   :  { %4333 = sst [smem:[#allocation10_spill]] %s4302_s2 }
   0x4   :  { %4334 = sst [smem:[#allocation11_spill]] %s4303_s3 }
   0x5   :  { %19 = vsyncpa [#allocation6], 0 }
   0x6   :  { %21 = vsyncpa [#allocation6 + $0x1], 0  ;;  %s3340_s29 = smov 0   ;;  %s3342_s30 = smov 0  }
   0x7   :  { %s3344_s15 = smov 0   ;;  %s3346_s16 = smov 0  }
   0x8 LB: > { %s3361_s17 = sadd.s32 4294967295, %s3244_s16   ;;  %s2828_s18 = sadd.s32 4294967294, %s3244_s16   ;;  %s3244_s16 = sphi %s3346_s16, %s4352_s16   ;;  %s3240_s15 = sphi %s3344_s15, %s4351_s15   ;;  %s3236_s30 = sphi %s3342_s30, %s4350_s30   ;;  %s3232_s29 = sphi %s3340_s29, %s4349_s29  }
   0x9   : > { %s3365_s19 = sadd.s32 1, %s3244_s16   ;;  %s333_s20 = sadd.s32 1, %s3240_s15 }
   0xa   : > { %s330_s21 = ssub.s32 %s3244_s16, %s3365_s19  ;;  %p343_p0 = scmp.ne.s32.totalorder %s3240_s15, %s3236_s30 }
   0xb   : > { %p331_p1 = scmp.eq.s32.totalorder %s330_s21, 0  ;;  %p344_p2 = scmp.eq.s32.totalorder %s3361_s17, 1 }
   0xc   : > { %p349_p3 = scmp.ne.s32.totalorder %s3236_s30, %s3232_s29  ;;  %p350_p4 = scmp.eq.s32.totalorder %s2828_s18, 1 }
   0xd   : > { %s3376_s22 = scalar_select %p331_p1, %s3240_s15, %s333_s20  }
   0xe   : > { %p3378_p5 = por %p344_p2, %p343_p0  ;;  %p3382_p6 = por %p350_p4, %p349_p3 }
   0xf   : > { %p2831_p7 = scmp.ge.s32.totalorder %s3244_s16, 1  ;;  %p415_p8 = scmp.lt.s32.totalorder %s3244_s16, 3 }
  0x11   : > { %p416_p9 = pnand %p2831_p7, %p415_p8 }
  0x12   : > { %p461_p10 = scmp.lt.s32.totalorder (!%p416_p9), %s3361_s17, 1  ;;  %s4337_s0 = sld [smem:[#allocation8_spill]] (!%p416_p9)  ;;  %vm495_vm0 = vcmask (!%p416_p9), 130048   ;;  %v3254_v8 = vmov (!%p416_p9), 0   ;;  %vm505_vm1 = vcmask (!%p416_p9), 1039360   ;;  %vm525_vm2 = vcmask (!%p416_p9), 1031168  }
  0x13   : > { %419 = sbr.rel (%p416_p9) target bundleno = 2116 (0x844), region = 76  ;;  %s4327_s20 = smov (!%p416_p9), 127   ;;  %3138 = vset.pattern.permute.xlu1 (!%p416_p9), %v3254_v8  ;;  %3137 = vset.pattern.permute.xlu0 (!%p416_p9), %v3254_v8  ;;  %vm545_vm3 = vcmask (!%p416_p9), 965632   ;;  %vm565_vm4 = vcmask (!%p416_p9), 957440   ;;  %vm585_vm5 = vcmask (!%p416_p9), 949248   ;;  %vm605_vm6 = vcmask (!%p416_p9), 883712  }
  0x14   : > { %s4323_s21 = smov (!%p416_p9), 126   ;;  %s4319_s27 = smov (!%p416_p9), 116   ;;  %vm625_vm7 = vcmask (!%p416_p9), 875520   ;;  %vm645_vm8 = vcmask (!%p416_p9), 867328   ;;  %vm905_vm9 = vcmask (!%p416_p9), 89088   ;;  %vm908_vm10 = vcmask (!%p416_p9), 310488  }
  0x15   : > { %s4321_s28 = smov (!%p416_p9), 108   ;;  %s4338_s1 = sld [smem:[#allocation9_spill]] (!%p416_p9)  ;;  %909 = vst.msk [vmem:[#allocation4 + $0x18] sm:$0xff] (!%p416_p9), %vm908_vm10, %v3254_v8  ;;  %910 = vst.msk [vmem:[#allocation4 + $0x38] sm:$0xff] (!%p416_p9), %vm908_vm10, %v3254_v8  ;;  %vm962_vm11 = vcmask (!%p416_p9), 220160   ;;  %vm958_vm12 = vcmask (!%p416_p9), 1047640  }
  0x16   : > { %s4339_s2 = sld [smem:[#allocation10_spill]] (!%p416_p9)  ;;  %906 = vst.msk [vmem:[#allocation4] sm:$0xff] (!%p416_p9), %vm905_vm9, %v3254_v8  ;;  %907 = vst.msk [vmem:[#allocation4 + $0x20] sm:$0xff] (!%p416_p9), %vm905_vm9, %v3254_v8  ;;  %s4347_s3 = sld [smem:[#allocation11_spill]] (!%p416_p9)  ;;  %vm1550_vm13 = vcmask (!%p416_p9), 261120   ;;  %vm3257_vm14 = vmmov (!%p416_p9), 0  }
  0x17   : > { %vm2260_vm15 = vcmask (!%p416_p9), 15360  }
  0x1a   : > { %s462_s25 = scalar_select %p461_p10, %s3361_s17, 1 }
  0x1b   : > { %v3147_v5 = vld [vmem:[%s4338_s1 + $0x4] ss:$8 sps:$4 sm:$0xff]  }
  0x1c   : > { %s2907_s26 = sshll.u32 %s462_s25, 5  ;;  %s4317_s25 = smov 118   ;;  %2843 = vmatprep.mubr.msk.bf16.mxu0 %vm495_vm0, %v3147_v5  ;;  %2845 = vmatprep.mubr.msk.bf16.mxu1 %vm495_vm0, %v3147_v5  ;;  %v697_v6 = vld [vmem:[%s4339_s2] sm:$0xff]  ;;  %v698_v7 = vld [vmem:[%s4339_s2 + $0x8] sm:$0xff]  ;;  %v700_v9 = vld [vmem:[%s4339_s2 + $0x18] sm:$0xff] }
  0x1d   : > { %s465_s18 = scalar_lea.vmem %s4337_s0, %s2907_s26  ;;  %s4315_s26 = smov 117   ;;  %v699_v10 = vld [vmem:[%s4339_s2 + $0x10] sm:$0xff] }
  0x1e   : > { %v3139_v0 = vld [vmem:[%s465_s18 + $0x4] ss:$16 sps:$4 sm:$0xff]   ;;  %v3141_v1 = vld [vmem:[%s465_s18] ss:$16 sps:$4 sm:$0xff]   ;;  %v3142_v2 = vld [vmem:[%s465_s18 + $0x8] ss:$16 sps:$4 sm:$0xff]  }
  0x1f   : > { %499 = vrot.lane.b32.xlu0 %v3139_v0, %s4327_s20  ;;  %v3144_v3 = vld [vmem:[%s465_s18 + $0xc] ss:$16 sps:$4 sm:$0xff]   ;;  %745 = vmatprep.subr.bf16.mxu0 %v3139_v0  ;;  %s4325_s18 = smov 107   ;;  %s3255_s0 = smov 11  }
  0x20   : > { %497 = vrot.lane.b32.xlu1 %v3141_v1, %s4327_s20  ;;  %746 = vmatpush1.bf16.msra.mxu0 %v3141_v1  ;;  %496 = vst.msk [vmem:[#allocation2 + $0x18] sm:$0xff] %vm495_vm0, %v3144_v3 }
  0x23   : > { %501 = vrot.lane.b32.xlu0 %v3142_v2, %s4327_s20 }
  0x24   : > { %503 = vrot.lane.b32.xlu1 %v3144_v3, %s4327_s20  ;;  %s4340_s20 = smov 127  }
  0x27   : > { %519 = vrot.lane.b32.xlu0 %v3139_v0, %s4323_s21  ;;  %v664_v4 = vld [vmem:[#allocation2 + $0x18] sm:$0xff] }
  0x28   : > { %521 = vrot.lane.b32.xlu1 %v3142_v2, %s4323_s21  ;;  %798 = vmatprep.subr.bf16.mxu1 %v664_v4 }
  0x29   : > { %799 = vmatpush1.bf16.msra.mxu1 %v3142_v2 }
  0x2b   : > { %517 = vrot.lane.b32.xlu0 %v3141_v1, %s4323_s21 }
  0x2c   : > { %523 = vrot.lane.b32.xlu1 %v3144_v3, %s4323_s21  ;;  %s4341_s21 = smov 126  }
  0x2f   : > { %539 = vrot.lane.b32.xlu0 %v3139_v0, %s4317_s25 }
  0x30   : > { %541 = vrot.lane.b32.xlu1 %v3142_v2, %s4317_s25 }
  0x33   : > { %537 = vrot.lane.b32.xlu0 %v3141_v1, %s4317_s25 }
  0x34   : > { %543 = vrot.lane.b32.xlu1 %v3144_v3, %s4317_s25  ;;  %s4345_s25 = smov 108  }
  0x37   : > { %559 = vrot.lane.b32.xlu0 %v3139_v0, %s4315_s26 }
  0x38   : > { %561 = vrot.lane.b32.xlu1 %v3142_v2, %s4315_s26 }
  0x3b   : > { %557 = vrot.lane.b32.xlu0 %v3141_v1, %s4315_s26 }
  0x3c   : > { %563 = vrot.lane.b32.xlu1 %v3144_v3, %s4315_s26  ;;  %s4346_s26 = smov 107  }
  0x3f   : > { %579 = vrot.lane.b32.xlu0 %v3139_v0, %s4319_s27 }
  0x40   : > { %581 = vrot.lane.b32.xlu1 %v3142_v2, %s4319_s27 }
  0x43   : > { %577 = vrot.lane.b32.xlu0 %v3141_v1, %s4319_s27 }
  0x44   : > { %583 = vrot.lane.b32.xlu1 %v3144_v3, %s4319_s27  ;;  %s4329_s27 = smov 106  }
  0x47   : > { %599 = vrot.lane.b32.xlu0 %v3139_v0, %s4321_s28 }
  0x48   : > { %601 = vrot.lane.b32.xlu1 %v3142_v2, %s4321_s28 }
  0x4b   : > { %597 = vrot.lane.b32.xlu0 %v3141_v1, %s4321_s28 }
  0x4c   : > { %603 = vrot.lane.b32.xlu1 %v3144_v3, %s4321_s28  ;;  %s4343_s28 = smov 117  }
  0x4f   : > { %619 = vrot.lane.b32.xlu0 %v3139_v0, %s4325_s18 }
  0x50   : > { %621 = vrot.lane.b32.xlu1 %v3142_v2, %s4325_s18 }
  0x53   : > { %617 = vrot.lane.b32.xlu0 %v3141_v1, %s4325_s18 }
  0x54   : > { %623 = vrot.lane.b32.xlu1 %v3144_v3, %s4325_s18  ;;  %s4344_s18 = smov 116  }
  0x57   : > { %639 = vrot.lane.b32.xlu0 %v3139_v0, %s4329_s27 }
  0x58   : > { %641 = vrot.lane.b32.xlu1 %v3142_v2, %s4329_s27 }
  0x5b   : > { %637 = vrot.lane.b32.xlu0 %v3141_v1, %s4329_s27 }
  0x5c   : > { %643 = vrot.lane.b32.xlu1 %v3144_v3, %s4329_s27  ;;  %s4342_s27 = smov 118  }
  0x5f   : > { %703 = vperm.xlu0 %3137, %v697_v6  }
  0x60   : > { %708 = vperm.xlu1 %3138, %v698_v7  }
  0x63   : > { %718 = vperm.xlu0 %3137, %v700_v9  }
  0x64   : > { %713 = vperm.xlu1 %3138, %v699_v10   ;;  %v3145_v10 = vld [vmem:[%s4338_s1] ss:$8 sps:$4 sm:$0xff]  }
  0x91   : > { %v500_v11 = vpop.permute.xlu0 %499 }
  0x92   : > { %v498_v12 = vpop.permute.xlu1 %497 }
  0x93   : > { %v506_v13 = vsel %vm505_vm1, %v498_v12, %v500_v11  ;;  %v3148_v12 = vld [vmem:[%s4338_s1 + $0x14] ss:$8 sps:$4 sm:$0xff]  }
  0x95   : > { %v502_v14 = vpop.permute.xlu0 %501 }
  0x96   : > { %v507_v15 = vsel %vm505_vm1, %v500_v11, %v502_v14  ;;  %v504_v16 = vpop.permute.xlu1 %503 }
  0x97   : > { %v508_v17 = vsel %vm505_vm1, %v502_v14, %v504_v16  ;;  %516 = vst.msk [vmem:[#allocation2 + $0x38] sm:$0xff] %vm495_vm0, %v504_v16  ;;  %747 = vmatprep.subr.bf16.mxu0 %v507_v15  ;;  %v3150_v14 = vld [vmem:[%s4338_s1 + $0x10] ss:$8 sps:$4 sm:$0xff]   ;;  %v869_v15 = vlaneseq  ;;  %s458_s1 = sand.u32 1, %s3236_s30  }
  0x98   : > { %748 = vmatpush1.bf16.msra.mxu0 %v506_v13  ;;  %s4137_s2 = sshll.u32 %s458_s1, 7 }
  0x99   : > { %v520_v18 = vpop.permute.xlu0 %519  ;;  %v870_v16 = vshrl.u32 %v869_v15, 7 }
  0x9a   : > { %v522_v19 = vpop.permute.xlu1 %521 }
  0x9b   : > { %v527_v20 = vsel %vm525_vm2, %v520_v18, %v522_v19 }
  0x9c   : > { %749 = vmatprep.subr.bf16.mxu0 %v527_v20 }
  0x9d   : > { %v518_v21 = vpop.permute.xlu0 %517 }
  0x9e   : > { %v526_v22 = vsel %vm525_vm2, %v518_v21, %v520_v18  ;;  %v524_v23 = vpop.permute.xlu1 %523  ;;  %v668_v24 = vld [vmem:[#allocation2 + $0x38] sm:$0xff]  ;;  %v875_v18 = vsub.s32 1, %v870_v16 }
  0x9f   : > { %v528_v25 = vsel %vm525_vm2, %v522_v19, %v524_v23  ;;  %536 = vst.msk [vmem:[#allocation2 + $0x58] sm:$0xff] %vm495_vm0, %v524_v23  ;;  %800 = vmatprep.subr.bf16.mxu1 %v668_v24  ;;  %750 = vmatpush1.bf16.msra.mxu0 %v526_v22  ;;  %v867_v22 = vld [vmem:[%s4311_s11] sm:$0xf] }
  0xa0   : > { %801 = vmatpush1.bf16.msra.mxu1 %v508_v17  ;;  %v871_v17 = vsub.s32 0, %v870_v16 }
  0xa1   : > { %v540_v26 = vpop.permute.xlu0 %539 }
  0xa2   : > { %v542_v27 = vpop.permute.xlu1 %541  ;;  %v872_v24 = vrot.slane %v867_v22, %v871_v17 }
  0xa3   : > { %v547_v28 = vsel %vm545_vm3, %v540_v26, %v542_v27 }
  0xa4   : > { %751 = vmatprep.subr.bf16.mxu0 %v547_v28 }
  0xa5   : > { %v538_v29 = vpop.permute.xlu0 %537 }
  0xa6   : > { %v546_v30 = vsel %vm545_vm3, %v538_v29, %v540_v26  ;;  %v544_v31 = vpop.permute.xlu1 %543  ;;  %v672_v32 = vld [vmem:[#allocation2 + $0x58] sm:$0xff] }
  0xa7   : > { %v548_v33 = vsel %vm545_vm3, %v542_v27, %v544_v31  ;;  %556 = vst.msk [vmem:[#allocation2 + $0x78] sm:$0xff] %vm495_vm0, %v544_v31  ;;  %802 = vmatprep.subr.bf16.mxu1 %v672_v32  ;;  %752 = vmatpush1.bf16.msra.mxu0 %v546_v30  ;;  %v876_v27 = vrot.slane %v867_v22, %v875_v18 }
  0xa8   : > { %803 = vmatpush1.bf16.msra.mxu1 %v528_v25 }
  0xa9   : > { %v560_v34 = vpop.permute.xlu0 %559 }
  0xaa   : > { %v562_v35 = vpop.permute.xlu1 %561 }
  0xab   : > { %v567_v36 = vsel %vm565_vm4, %v560_v34, %v562_v35 }
  0xac   : > { %574 = vst [vmem:[#allocation2 + $0x88] sm:$0xff] %v567_v36  ;;  %753 = vmatprep.subr.bf16.mxu0 %v567_v36 }
  0xad   : > { %v558_v37 = vpop.permute.xlu0 %557 }
  0xae   : > { %v566_v38 = vsel %vm565_vm4, %v558_v37, %v560_v34  ;;  %v3459_v39 = vpop.permute.xlu1 %563  ;;  %v676_v40 = vld [vmem:[#allocation2 + $0x78] sm:$0xff] }
  0xaf   : > { %573 = vst [vmem:[#allocation2 + $0x80] sm:$0xff] %v566_v38  ;;  %v568_v41 = vsel %vm565_vm4, %v562_v35, %v3459_v39  ;;  %576 = vst.msk [vmem:[#allocation2 + $0x98] sm:$0xff] %vm495_vm0, %v3459_v39  ;;  %804 = vmatprep.subr.bf16.mxu1 %v676_v40  ;;  %754 = vmatpush1.bf16.msra.mxu0 %v566_v38  ;;  %v879_v35 = vsub.s32 2, %v870_v16 }
  0xb0   : > { %575 = vst [vmem:[#allocation2 + $0x90] sm:$0xff] %v568_v41  ;;  %805 = vmatpush1.bf16.msra.mxu1 %v548_v33 }
  0xb1   : > { %v580_v42 = vpop.permute.xlu0 %579 }
  0xb2   : > { %v582_v43 = vpop.permute.xlu1 %581 }
  0xb3   : > { %v587_v44 = vsel %vm585_vm5, %v580_v42, %v582_v43 }
  0xb4   : > { %755 = vmatprep.subr.bf16.mxu0 %v587_v44 }
  0xb5   : > { %v578_v45 = vpop.permute.xlu0 %577 }
  0xb6   : > { %v586_v46 = vsel %vm585_vm5, %v578_v45, %v580_v42  ;;  %v584_v47 = vpop.permute.xlu1 %583  ;;  %v680_v48 = vld [vmem:[#allocation2 + $0x98] sm:$0xff] }
  0xb7   : > { %v588_v49 = vsel %vm585_vm5, %v582_v43, %v584_v47  ;;  %596 = vst.msk [vmem:[#allocation2 + $0xb8] sm:$0xff] %vm495_vm0, %v584_v47  ;;  %806 = vmatprep.subr.bf16.mxu1 %v680_v48  ;;  %756 = vmatpush1.bf16.msra.mxu0 %v586_v46 }
  0xb8   : > { %807 = vmatpush1.bf16.msra.mxu1 %v568_v41  ;;  %v883_v41 = vsub.s32 3, %v870_v16 }
  0xb9   : > { %v600_v50 = vpop.permute.xlu0 %599 }
  0xba   : > { %v602_v51 = vpop.permute.xlu1 %601 }
  0xbb   : > { %v607_v52 = vsel %vm605_vm6, %v600_v50, %v602_v51 }
  0xbc   : > { %757 = vmatprep.subr.bf16.mxu0 %v607_v52 }
  0xbd   : > { %v598_v53 = vpop.permute.xlu0 %597 }
  0xbe   : > { %v606_v54 = vsel %vm605_vm6, %v598_v53, %v600_v50  ;;  %v604_v55 = vpop.permute.xlu1 %603  ;;  %v684_v56 = vld [vmem:[#allocation2 + $0xb8] sm:$0xff] }
  0xbf   : > { %v608_v57 = vsel %vm605_vm6, %v602_v51, %v604_v55  ;;  %616 = vst.msk [vmem:[#allocation2 + $0xd8] sm:$0xff] %vm495_vm0, %v604_v55  ;;  %808 = vmatprep.subr.bf16.mxu1 %v684_v56  ;;  %758 = vmatpush1.bf16.msra.mxu0 %v606_v54  ;;  %v880_v51 = vrot.slane %v867_v22, %v879_v35 }
  0xc0   : > { %809 = vmatpush1.bf16.msra.mxu1 %v588_v49 }
  0xc1   : > { %v620_v58 = vpop.permute.xlu0 %619 }
  0xc2   : > { %v622_v59 = vpop.permute.xlu1 %621 }
  0xc3   : > { %v627_v60 = vsel %vm625_vm7, %v620_v58, %v622_v59 }
  0xc4   : > { %759 = vmatprep.subr.bf16.mxu0 %v627_v60 }
  0xc5   : > { %v618_v61 = vpop.permute.xlu0 %617 }
  0xc6   : > { %v626_v62 = vsel %vm625_vm7, %v618_v61, %v620_v58  ;;  %v624_v63 = vpop.permute.xlu1 %623  ;;  %v688_v0 = vld [vmem:[#allocation2 + $0xd8] sm:$0xff] }
  0xc7   : > { %v628_v1 = vsel %vm625_vm7, %v622_v59, %v624_v63  ;;  %636 = vst.msk [vmem:[#allocation2 + $0xf8] sm:$0xff] %vm495_vm0, %v624_v63  ;;  %810 = vmatprep.subr.bf16.mxu1 %v688_v0  ;;  %760 = vmatpush1.bf16.msra.mxu0 %v626_v62 }
  0xc8   : > { %811 = vmatpush1.bf16.msra.mxu1 %v608_v57  ;;  %v884_v57 = vrot.slane %v867_v22, %v883_v41 }
  0xc9   : > { %v640_v2 = vpop.permute.xlu0 %639 }
  0xca   : > { %v642_v3 = vpop.permute.xlu1 %641 }
  0xcb   : > { %v647_v4 = vsel %vm645_vm8, %v640_v2, %v642_v3 }
  0xcc   : > { %761 = vmatprep.subr.bf16.mxu0 %v647_v4 }
  0xcd   : > { %v638_v5 = vpop.permute.xlu0 %637 }
  0xce   : > { %v646_v6 = vsel %vm645_vm8, %v638_v5, %v640_v2  ;;  %v644_v7 = vpop.permute.xlu1 %643  ;;  %v692_v9 = vld [vmem:[#allocation2 + $0xf8] sm:$0xff] }
  0xcf   : > { %v648_v11 = vsel %vm645_vm8, %v642_v3, %v644_v7  ;;  %656 = vst.msk [vmem:[#allocation2 + $0x118] sm:$0xff] %vm495_vm0, %v644_v7  ;;  %812 = vmatprep.subr.bf16.mxu1 %v692_v9  ;;  %762 = vmatpush1.bf16.msra.mxu0 %v646_v6 }
  0xd0   : > { %813 = vmatpush1.bf16.msra.mxu1 %v628_v1 }
  0xd2   : > { %778 = vmatmul.mubr.bf16.vlgmr.msra.gmra.mrb[0].mxu0 %v3145_v10 }
  0xd3   : > { %2844 = vmatprep.mubr.msk.bf16.mxu0 %vm495_vm0, %v3148_v12 }
  0xd6   : > { %v696_v13 = vld [vmem:[#allocation2 + $0x118] sm:$0xff] }
  0xd7   : > { %814 = vmatprep.subr.bf16.mxu1 %v696_v13 }
  0xd8   : > { %815 = vmatpush1.bf16.msra.mxu1 %v648_v11 }
  0xda   : > { %788 = vmatmul.mubr.bf16.gmra.mrb[4].mxu0 %v3150_v14 }
  0xdb   : > { %831 = vmatmul.mubr.bf16.vlgmr.msra.gmra.mrb[0].mxu1 %v3145_v10 }
  0xdc   : > { %2846 = vmatprep.mubr.msk.bf16.mxu1 %vm495_vm0, %v3148_v12 }
  0xde   : > { %v704_v19 = vpop.permute.xlu0 %703 }
  0xdf   : > { %v709_v20 = vpop.permute.xlu1 %708 }
  0xe2   : > { %v719_v43 = vpop.permute.xlu0 %718 }
  0xe3   : > { %841 = vmatmul.mubr.bf16.gmra.mrb[4].mxu1 %v3150_v14  ;;  %v714_v38 = vpop.permute.xlu1 %713 }
 0x1a5   : > { %v779_v21 = vpop.f32.mrb[0].mxu0 }
 0x1a6   : > { %v780_v23 = vadd.f32 %v779_v21, %v704_v19  ;;  %v781_v25 = vpop.f32.mrb[1].mxu0 }
 0x1a7   : > { %v782_v26 = vadd.f32 %v781_v25, %v704_v19  ;;  %v783_v28 = vpop.f32.mrb[2].mxu0 }
 0x1a8   : > { %v851_v29 = vmax.f32 %v780_v23, 0.0  ;;  %v784_v30 = vadd.f32 %v783_v28, %v709_v20  ;;  %v785_v31 = vpop.f32.mrb[3].mxu0 }
 0x1a9   : > { %v852_v32 = vmax.f32 %v782_v26, 0.0  ;;  %v786_v33 = vadd.f32 %v785_v31, %v709_v20 }
 0x1aa   : > { %v3495_v34 = vmul.f32 %v872_v24, %v851_v29  ;;  %v855_v36 = vmax.f32 %v784_v30, 0.0 }
 0x1ab   : > { %v3497_v37 = vmul.f32 %v876_v27, %v852_v32  ;;  %v856_v40 = vmax.f32 %v786_v33, 0.0 }
 0x1ac   : > { %v3499_v42 = vmul.f32 %v872_v24, %v855_v36 }
 0x1ad   : > { %v894_v44 = vmul.f32 %v876_v27, %v856_v40  ;;  %v789_v45 = vpop.f32.mrb[4].mxu0 }
 0x1ae   : > { %v832_v46 = vpop.f32.mrb[0].mxu1  ;;  %v790_v47 = vadd.f32 %v789_v45, %v714_v38  ;;  %v791_v48 = vpop.f32.mrb[5].mxu0  ;;  %v911_v49 = vpack.c.bf16 %v3499_v42, %v3495_v34 }
 0x1af   : > { %v833_v50 = vadd.f32 %v832_v46, %v704_v19  ;;  %v834_v52 = vpop.f32.mrb[1].mxu1  ;;  %v792_v53 = vadd.f32 %v791_v48, %v714_v38  ;;  %v793_v54 = vpop.f32.mrb[6].mxu0  ;;  %v912_v55 = vpack.c.bf16 %v894_v44, %v3497_v37 }
 0x1b0   : > { %v835_v56 = vadd.f32 %v834_v52, %v704_v19  ;;  %v836_v58 = vpop.f32.mrb[2].mxu1  ;;  %v859_v59 = vmax.f32 %v790_v47, 0.0  ;;  %v794_v60 = vadd.f32 %v793_v54, %v719_v43  ;;  %v795_v61 = vpop.f32.mrb[7].mxu0 }
 0x1b1   : > { %v853_v62 = vmax.f32 %v833_v50, 0.0  ;;  %v837_v63 = vadd.f32 %v836_v58, %v709_v20  ;;  %v838_v0 = vpop.f32.mrb[3].mxu1  ;;  %v860_v1 = vmax.f32 %v792_v53, 0.0  ;;  %v796_v2 = vadd.f32 %v795_v61, %v719_v43  ;;  %v3153_v61 = vld [vmem:[%s4347_s3 + $0x4] ss:$12 sps:$4 sm:$0xff]  }
 0x1b2   : > { %v854_v3 = vmax.f32 %v835_v56, 0.0  ;;  %v839_v4 = vadd.f32 %v838_v0, %v709_v20  ;;  %v897_v5 = vmul.f32 %v872_v24, %v859_v59  ;;  %v863_v6 = vmax.f32 %v794_v60, 0.0  ;;  %1695 = vmatprep.mubr.bf16.mxu1 %v3153_v61  ;;  %1589 = vmatprep.mubr.bf16.mxu0 %v3153_v61 }
 0x1b3   : > { %v857_v7 = vmax.f32 %v837_v63, 0.0  ;;  %v898_v9 = vmul.f32 %v876_v27, %v860_v1  ;;  %v864_v10 = vmax.f32 %v796_v2, 0.0  ;;  %v891_v13 = vmul.f32 %v880_v51, %v853_v62 }
 0x1b4   : > { %v858_v11 = vmax.f32 %v839_v4, 0.0  ;;  %v901_v12 = vmul.f32 %v872_v24, %v863_v6  ;;  %v892_v16 = vmul.f32 %v884_v57, %v854_v3 }
 0x1b5   : > { %v895_v14 = vmul.f32 %v880_v51, %v857_v7  ;;  %v902_v15 = vmul.f32 %v876_v27, %v864_v10  ;;  %v1496_v7 = vld [vmem:[%s4304_s4] sm:$0xff]  ;;  %v1499_v10 = vld [vmem:[%s4304_s4 + $0x18] sm:$0xff] }
 0x1b6   : > { %v896_v17 = vmul.f32 %v884_v57, %v858_v11  ;;  %v842_v18 = vpop.f32.mrb[4].mxu1  ;;  %v915_v19 = vpack.c.bf16 %v901_v12, %v897_v5  ;;  %v1497_v5 = vld [vmem:[%s4304_s4 + $0x8] sm:$0xff]  ;;  %v1498_v12 = vld [vmem:[%s4304_s4 + $0x10] sm:$0xff] }
 0x1b7   : > { %v843_v21 = vadd.f32 %v842_v18, %v714_v38  ;;  %v844_v22 = vpop.f32.mrb[5].mxu1  ;;  %v913_v23 = vpack.c.bf16 %v895_v14, %v891_v13  ;;  %v916_v25 = vpack.c.bf16 %v902_v15, %v898_v9  ;;  %v2236_v14 = vld [vmem:[%s4310_s10] sm:$0xff] }
 0x1b8   : > { %v845_v26 = vadd.f32 %v844_v22, %v714_v38  ;;  %v846_v20 = vpop.f32.mrb[6].mxu1  ;;  %v914_v28 = vpack.c.bf16 %v896_v17, %v892_v16  ;;  %v2152_v17 = vld [vmem:[%s4308_s8] sm:$0x3]  ;;  %v2238_v22 = vld [vmem:[%s4310_s10 + $0x10] sm:$0xff] }
 0x1b9   : > { %v861_v29 = vmax.f32 %v843_v21, 0.0  ;;  %v847_v30 = vadd.f32 %v846_v20, %v719_v43  ;;  %v848_v31 = vpop.f32.mrb[7].mxu1  ;;  %931 = vrot.lane.b32.xlu1 %v913_v23, %s3255_s0 }
 0x1ba   : > { %v862_v24 = vmax.f32 %v845_v26, 0.0  ;;  %v849_v32 = vadd.f32 %v848_v31, %v719_v43  ;;  %933 = vrot.lane.b32.xlu0 %v914_v28, %s3255_s0  ;;  %v2237_v26 = vld [vmem:[%s4310_s10 + $0x8] sm:$0xff] }
 0x1bb   : > { %v865_v27 = vmax.f32 %v847_v30, 0.0  ;;  %v899_v34 = vmul.f32 %v880_v51, %v861_v29  ;;  %v1773_v30 = vld [vmem:[%s4306_s6] sm:$0xff] }
 0x1bc   : > { %v866_v33 = vmax.f32 %v849_v32, 0.0  ;;  %v900_v36 = vmul.f32 %v884_v57, %v862_v24  ;;  %v2239_v32 = vld [vmem:[%s4310_s10 + $0x18] sm:$0xff] }
 0x1bd   : > { %v903_v35 = vmul.f32 %v880_v51, %v865_v27  ;;  %927 = vrot.lane.b32.xlu1 %v911_v49, %s3255_s0 }
 0x1be   : > { %v904_v37 = vmul.f32 %v884_v57, %v866_v33  ;;  %929 = vrot.lane.b32.xlu0 %v912_v55, %s3255_s0 }
 0x1bf   : > { %v917_v40 = vpack.c.bf16 %v903_v35, %v899_v34  ;;  %v1775_v35 = vld [vmem:[%s4306_s6 + $0x10] sm:$0xff] }
 0x1c0   : > { %v918_v38 = vpack.c.bf16 %v904_v37, %v900_v36 }
 0x1c1   : > { %935 = vrot.lane.b32.xlu1 %v915_v19, %s3255_s0 }
 0x1c2   : > { %937 = vrot.lane.b32.xlu0 %v916_v25, %s3255_s0 }
 0x1c5   : > { %939 = vrot.lane.b32.xlu1 %v917_v40, %s3255_s0  ;;  %v1774_v40 = vld [vmem:[%s4306_s6 + $0x8] sm:$0xff] }
 0x1c6   : > { %941 = vrot.lane.b32.xlu0 %v918_v38, %s3255_s0 }
 0x22b   : > { %v932_v41 = vpop.permute.xlu1 %931 }
 0x22c   : > { %v934_v42 = vpop.permute.xlu0 %933 }
 0x22d   : > { %v946_v43 = vsel %vm905_vm9, %v932_v41, %v934_v42 }
 0x22e   : > { %963 = vst.msk [vmem:[#allocation4 + $0x18] sm:$0xff] %vm962_vm11, %v946_v43 }
 0x22f   : > { %v928_v44 = vpop.permute.xlu1 %927 }
 0x230   : > { %959 = vst.msk [vmem:[#allocation4] sm:$0xff] %vm958_vm12, %v928_v44  ;;  %v930_v45 = vpop.permute.xlu0 %929 }
 0x231   : > { %v3513_v46 = vsel %vm905_vm9, %v928_v44, %v930_v45  ;;  %v3516_v47 = vsel %vm905_vm9, %v930_v45, %v932_v41  ;;  %v1776_v45 = vld [vmem:[%s4306_s6 + $0x18] sm:$0xff] }
 0x232   : > { %1557 = vmatprep.subr.bf16.mxu0 %v3513_v46 }
 0x233   : > { %v936_v48 = vpop.permute.xlu1 %935 }
 0x234   : > { %964 = vst.msk [vmem:[#allocation4 + $0x20] sm:$0xff] %vm958_vm12, %v936_v48  ;;  %v938_v49 = vpop.permute.xlu0 %937 }
 0x235   : > { %v3520_v50 = vsel %vm905_vm9, %v936_v48, %v938_v49  ;;  %v3522_v51 = vld [vmem:[#allocation4 + $0x18] sm:$0xff] }
 0x236   : > { %1006 = vrot.lane.b32.xlu0 %v3522_v51, %s4340_s20  ;;  %979 = vst.msk [vmem:[#allocation3 + $0x18] sm:$0xff] %vm495_vm0, %v3522_v51 }
 0x237   : > { %v3528_v52 = vld [vmem:[#allocation4] sm:$0xff]  ;;  %v940_v53 = vpop.permute.xlu1 %939 }
 0x238   : > { %v3531_v54 = vsel %vm905_vm9, %v938_v49, %v940_v53  ;;  %v942_v55 = vpop.permute.xlu0 %941  ;;  %1000 = vrot.lane.b32.xlu1 %v3528_v52, %s4340_s20  ;;  %1558 = vmatpush1.bf16.msra.mxu0 %v3528_v52 }
 0x239   : > { %v949_v56 = vsel %vm905_vm9, %v940_v53, %v942_v55  ;;  %1559 = vmatprep.subr.bf16.mxu0 %v3520_v50 }
 0x23a   : > { %967 = vst.msk [vmem:[#allocation4 + $0x38] sm:$0xff] %vm962_vm11, %v949_v56  ;;  %1060 = vrot.lane.b32.xlu0 %v3522_v51, %s4341_s21 }
 0x23b   : > { %v3541_v57 = vld [vmem:[#allocation4 + $0x20] sm:$0xff] }
 0x23c   : > { %1054 = vrot.lane.b32.xlu1 %v3528_v52, %s4341_s21  ;;  %1560 = vmatpush1.bf16.msra.mxu0 %v3541_v57 }
 0x23d   : > { %v1427_v58 = vld [vmem:[#allocation3 + $0x18] sm:$0xff] }
 0x23e   : > { %1663 = vmatprep.subr.bf16.mxu1 %v1427_v58  ;;  %1114 = vrot.lane.b32.xlu0 %v3522_v51, %s4342_s27 }
 0x23f   : > { %1664 = vmatpush1.bf16.msra.mxu1 %v3516_v47 }
 0x240   : > { %1108 = vrot.lane.b32.xlu1 %v3528_v52, %s4342_s27 }
 0x241   : > { %v3551_v59 = vld [vmem:[#allocation4 + $0x38] sm:$0xff] }
 0x242   : > { %1168 = vrot.lane.b32.xlu0 %v3522_v51, %s4343_s28  ;;  %983 = vst.msk [vmem:[#allocation3 + $0x38] sm:$0xff] %vm495_vm0, %v3551_v59 }
 0x244   : > { %1162 = vrot.lane.b32.xlu1 %v3528_v52, %s4343_s28 }
 0x246   : > { %1222 = vrot.lane.b32.xlu0 %v3522_v51, %s4344_s18 }
 0x248   : > { %1216 = vrot.lane.b32.xlu1 %v3528_v52, %s4344_s18 }
 0x249   : > { %v1431_v60 = vld [vmem:[#allocation3 + $0x38] sm:$0xff] }
 0x24a   : > { %1004 = vrot.lane.b32.xlu0 %v3516_v47, %s4340_s20  ;;  %1665 = vmatprep.subr.bf16.mxu1 %v1431_v60 }
 0x24b   : > { %1666 = vmatpush1.bf16.msra.mxu1 %v3531_v54 }
 0x24c   : > { %1002 = vrot.lane.b32.xlu1 %v3513_v46, %s4340_s20 }
 0x24e   : > { %1058 = vrot.lane.b32.xlu0 %v3516_v47, %s4341_s21 }
 0x250   : > { %1056 = vrot.lane.b32.xlu1 %v3513_v46, %s4341_s21 }
 0x252   : > { %1112 = vrot.lane.b32.xlu0 %v3516_v47, %s4342_s27 }
 0x254   : > { %1110 = vrot.lane.b32.xlu1 %v3513_v46, %s4342_s27 }
 0x256   : > { %1166 = vrot.lane.b32.xlu0 %v3516_v47, %s4343_s28 }
 0x258   : > { %1164 = vrot.lane.b32.xlu1 %v3513_v46, %s4343_s28 }
 0x25a   : > { %1220 = vrot.lane.b32.xlu0 %v3516_v47, %s4344_s18 }
 0x25c   : > { %1218 = vrot.lane.b32.xlu1 %v3513_v46, %s4344_s18 }
 0x25e   : > { %1014 = vrot.lane.b32.xlu0 %v3551_v59, %s4340_s20 }
 0x260   : > { %1008 = vrot.lane.b32.xlu1 %v3541_v57, %s4340_s20 }
 0x262   : > { %1068 = vrot.lane.b32.xlu0 %v3551_v59, %s4341_s21 }
 0x264   : > { %1062 = vrot.lane.b32.xlu1 %v3541_v57, %s4341_s21 }
 0x266   : > { %1122 = vrot.lane.b32.xlu0 %v3551_v59, %s4342_s27 }
 0x268   : > { %1116 = vrot.lane.b32.xlu1 %v3541_v57, %s4342_s27 }
 0x26a   : > { %1176 = vrot.lane.b32.xlu0 %v3551_v59, %s4343_s28 }
 0x26c   : > { %1170 = vrot.lane.b32.xlu1 %v3541_v57, %s4343_s28 }
 0x26e   : > { %1012 = vrot.lane.b32.xlu0 %v3531_v54, %s4340_s20 }
 0x270   : > { %1010 = vrot.lane.b32.xlu1 %v3520_v50, %s4340_s20  ;;  %s4160_s20 = scalar_lea.vmem [#allocation5], %s4137_s2 }
 0x272   : > { %1230 = vrot.lane.b32.xlu0 %v3551_v59, %s4344_s18 }
 0x274   : > { %1224 = vrot.lane.b32.xlu1 %v3541_v57, %s4344_s18 }
 0x276   : > { %1066 = vrot.lane.b32.xlu0 %v3531_v54, %s4341_s21 }
 0x278   : > { %1064 = vrot.lane.b32.xlu1 %v3520_v50, %s4341_s21  ;;  %s4348_s21 = smov 106  }
 0x27a   : > { %1274 = vrot.lane.b32.xlu0 %v3516_v47, %s4345_s25 }
 0x27c   : > { %1272 = vrot.lane.b32.xlu1 %v3513_v46, %s4345_s25 }
 0x27e   : > { %1120 = vrot.lane.b32.xlu0 %v3531_v54, %s4342_s27 }
 0x280   : > { %1118 = vrot.lane.b32.xlu1 %v3520_v50, %s4342_s27  ;;  %s3260_s27 = smov 28  }
 0x282   : > { %1276 = vrot.lane.b32.xlu0 %v3522_v51, %s4345_s25 }
 0x284   : > { %1270 = vrot.lane.b32.xlu1 %v3528_v52, %s4345_s25 }
 0x286   : > { %1174 = vrot.lane.b32.xlu0 %v3531_v54, %s4343_s28 }
 0x288   : > { %1172 = vrot.lane.b32.xlu1 %v3520_v50, %s4343_s28  ;;  %s2909_s28 = sshll.u32 %s3361_s17, 11  ;;  %s4259_s17 = scalar_lea.sflag [#allocation6], %s458_s1 }
 0x289   : > { %s4250_s0 = scalar_lea.hbm %s4314_s14, %s2909_s28 }
 0x28a   : > { %1284 = vrot.lane.b32.xlu0 %v3551_v59, %s4345_s25 }
 0x28c   : > { %1278 = vrot.lane.b32.xlu1 %v3541_v57, %s4345_s25 }
 0x28e   : > { %1228 = vrot.lane.b32.xlu0 %v3531_v54, %s4344_s18 }
 0x290   : > { %1226 = vrot.lane.b32.xlu1 %v3520_v50, %s4344_s18  ;;  %s2766_s18 = sshll.u32 %s4160_s20, 4  ;;  %s4252_s18 = int_to_ptr.vmem [resolvable:$true] %s2766_s18 }
 0x291   : > { %s3182_s2 = scalar_lea.vmem %s4252_s18, 2048 }
 0x292   : > { %1328 = vrot.lane.b32.xlu0 %v3516_v47, %s4346_s26  ;;  %p3183_p11 = scmp.ne.s32.totalorder %s4252_s18, %s3182_s2 }
 0x294   : > { %1326 = vrot.lane.b32.xlu1 %v3513_v46, %s4346_s26  ;;  %p3184_p12 = pnand %p3183_p11, %p3378_p5 }
 0x296   : > { %1282 = vrot.lane.b32.xlu0 %v3531_v54, %s4345_s25  ;;  %p3185_p13 = pneg %p3184_p12 }
 0x298   : > { %1280 = vrot.lane.b32.xlu1 %v3520_v50, %s4345_s25 }
 0x29a   : > { %1330 = vrot.lane.b32.xlu0 %v3522_v51, %s4346_s26 }
 0x29c   : > { %1324 = vrot.lane.b32.xlu1 %v3528_v52, %s4346_s26 }
 0x29e   : > { %1336 = vrot.lane.b32.xlu0 %v3531_v54, %s4346_s26 }
 0x2a0   : > { %1334 = vrot.lane.b32.xlu1 %v3520_v50, %s4346_s26 }
 0x2a2   : > { %1338 = vrot.lane.b32.xlu0 %v3551_v59, %s4346_s26 }
 0x2a4   : > { %1332 = vrot.lane.b32.xlu1 %v3541_v57, %s4346_s26 }
 0x2a6   : > { %1382 = vrot.lane.b32.xlu0 %v3516_v47, %s4348_s21 }
 0x2a8   : > { %v1007_v62 = vpop.permute.xlu0 %1006  ;;  %1380 = vrot.lane.b32.xlu1 %v3513_v46, %s4348_s21 }
 0x2a9   : > { %1033 = vst.msk [vmem:[#allocation3 + $0x58] sm:$0xff] %vm495_vm0, %v1007_v62 }
 0x2aa   : > { %1384 = vrot.lane.b32.xlu0 %v3522_v51, %s4348_s21  ;;  %v1001_v63 = vpop.permute.xlu1 %1000 }
 0x2ac   : > { %v1061_v0 = vpop.permute.xlu0 %1060  ;;  %1378 = vrot.lane.b32.xlu1 %v3528_v52, %s4348_s21 }
 0x2ad   : > { %1087 = vst.msk [vmem:[#allocation3 + $0x98] sm:$0xff] %vm495_vm0, %v1061_v0 }
 0x2ae   : > { %1390 = vrot.lane.b32.xlu0 %v3531_v54, %s4348_s21  ;;  %v1055_v1 = vpop.permute.xlu1 %1054 }
 0x2b0   : > { %v1115_v2 = vpop.permute.xlu0 %1114  ;;  %1388 = vrot.lane.b32.xlu1 %v3520_v50, %s4348_s21  ;;  %v1435_v3 = vld [vmem:[#allocation3 + $0x58] sm:$0xff] }
 0x2b1   : > { %1141 = vst.msk [vmem:[#allocation3 + $0xd8] sm:$0xff] %vm495_vm0, %v1115_v2  ;;  %1667 = vmatprep.subr.bf16.mxu1 %v1435_v3 }
 0x2b2   : > { %1392 = vrot.lane.b32.xlu0 %v3551_v59, %s4348_s21  ;;  %v1109_v4 = vpop.permute.xlu1 %1108 }
 0x2b4   : > { %v1169_v6 = vpop.permute.xlu0 %1168  ;;  %1386 = vrot.lane.b32.xlu1 %v3541_v57, %s4348_s21  ;;  %v1443_v61 = vld [vmem:[#allocation3 + $0x98] sm:$0xff]  ;;  %s3261_s21 = smov 84  }
 0x2b5   : > { %1195 = vst.msk [vmem:[#allocation3 + $0x118] sm:$0xff] %vm495_vm0, %v1169_v6 }
 0x2b6   : > { %1507 = vperm.xlu0 %3137, %v1497_v5   ;;  %v1163_v9 = vpop.permute.xlu1 %1162 }
 0x2b8   : > { %v1223_v11 = vpop.permute.xlu0 %1222  ;;  %1502 = vperm.xlu1 %3138, %v1496_v7  }
 0x2b9   : > { %1249 = vst.msk [vmem:[#allocation3 + $0x158] sm:$0xff] %vm495_vm0, %v1223_v11 }
 0x2ba   : > { %1517 = vperm.xlu0 %3137, %v1499_v10   ;;  %v1217_v13 = vpop.permute.xlu1 %1216 }
 0x2bc   : > { %v1005_v15 = vpop.permute.xlu0 %1004  ;;  %1512 = vperm.xlu1 %3138, %v1498_v12  }
 0x2bd   : > { %v1018_v16 = vsel %vm505_vm1, %v1005_v15, %v1007_v62 }
 0x2be   : > { %2242 = vperm.xlu0 %3137, %v2236_v14   ;;  %v1003_v18 = vpop.permute.xlu1 %1002  ;;  %1668 = vmatpush1.bf16.msra.mxu1 %v1018_v16 }
 0x2bf   : > { %v1016_v19 = vsel %vm505_vm1, %v1001_v63, %v1003_v18  ;;  %v1017_v21 = vsel %vm505_vm1, %v1003_v18, %v1005_v15 }
 0x2c0   : > { %v1059_v23 = vpop.permute.xlu0 %1058  ;;  %2155 = vperm.xlu1 %3138, %v2152_v17   ;;  %1561 = vmatprep.subr.bf16.mxu0 %v1017_v21  ;;  %v1459_v17 = vld [vmem:[#allocation3 + $0x118] sm:$0xff] }
 0x2c1   : > { %v1072_v25 = vsel %vm525_vm2, %v1059_v23, %v1061_v0  ;;  %1562 = vmatpush1.bf16.msra.mxu0 %v1016_v19 }
 0x2c2   : > { %2252 = vperm.xlu0 %3137, %v2238_v22   ;;  %v1057_v20 = vpop.permute.xlu1 %1056 }
 0x2c3   : > { %v1070_v28 = vsel %vm525_vm2, %v1055_v1, %v1057_v20  ;;  %v1071_v29 = vsel %vm525_vm2, %v1057_v20, %v1059_v23 }
 0x2c4   : > { %v1113_v31 = vpop.permute.xlu0 %1112  ;;  %2247 = vperm.xlu1 %3138, %v2237_v26  }
 0x2c5   : > { %v3714_v24 = vsel %vm545_vm3, %v1113_v31, %v1115_v2 }
 0x2c6   : > { %1779 = vperm.xlu0 %3137, %v1773_v30   ;;  %v1111_v27 = vpop.permute.xlu1 %1110  ;;  %v1467_v30 = vld [vmem:[#allocation3 + $0x158] sm:$0xff] }
 0x2c7   : > { %v3720_v33 = vsel %vm545_vm3, %v1109_v4, %v1111_v27  ;;  %v1125_v34 = vsel %vm545_vm3, %v1111_v27, %v1113_v31 }
 0x2c8   : > { %v1167_v36 = vpop.permute.xlu0 %1166  ;;  %2257 = vperm.xlu1 %3138, %v2239_v32  }
 0x2c9   : > { %v3727_v37 = vsel %vm565_vm4, %v1167_v36, %v1169_v6  ;;  %v1451_v6 = vld [vmem:[#allocation3 + $0xd8] sm:$0xff] }
 0x2ca   : > { %1789 = vperm.xlu0 %3137, %v1775_v35   ;;  %v1165_v38 = vpop.permute.xlu1 %1164 }
 0x2cb   : > { %v3733_v41 = vsel %vm565_vm4, %v1163_v9, %v1165_v38  ;;  %v3736_v42 = vsel %vm565_vm4, %v1165_v38, %v1167_v36 }
 0x2cc   : > { %v1221_v43 = vpop.permute.xlu0 %1220  ;;  %1784 = vperm.xlu1 %3138, %v1774_v40  }
 0x2cd   : > { %v3739_v44 = vsel %vm585_vm5, %v1221_v43, %v1223_v11 }
 0x2ce   : > { %v1219_v46 = vpop.permute.xlu1 %1218 }
 0x2cf   : > { %v3745_v47 = vsel %vm585_vm5, %v1217_v13, %v1219_v46  ;;  %v3748_v48 = vsel %vm585_vm5, %v1219_v46, %v1221_v43 }
 0x2d0   : > { %1794 = vperm.xlu1 %3138, %v1776_v45   ;;  %v1015_v49 = vpop.permute.xlu0 %1014 }
 0x2d1   : > { %1037 = vst.msk [vmem:[#allocation3 + $0x78] sm:$0xff] %vm495_vm0, %v1015_v49 }
 0x2d2   : > { %v1009_v50 = vpop.permute.xlu1 %1008 }
 0x2d4   : > { %v1069_v51 = vpop.permute.xlu0 %1068 }
 0x2d5   : > { %1091 = vst.msk [vmem:[#allocation3 + $0xb8] sm:$0xff] %vm495_vm0, %v1069_v51 }
 0x2d6   : > { %v1063_v52 = vpop.permute.xlu1 %1062 }
 0x2d8   : > { %v1123_v53 = vpop.permute.xlu0 %1122  ;;  %v1439_v54 = vld [vmem:[#allocation3 + $0x78] sm:$0xff] }
 0x2d9   : > { %1145 = vst.msk [vmem:[#allocation3 + $0xf8] sm:$0xff] %vm495_vm0, %v1123_v53  ;;  %1669 = vmatprep.subr.bf16.mxu1 %v1439_v54 }
 0x2da   : > { %v1117_v55 = vpop.permute.xlu1 %1116 }
 0x2dc   : > { %v1177_v56 = vpop.permute.xlu0 %1176  ;;  %v1447_v2 = vld [vmem:[#allocation3 + $0xb8] sm:$0xff] }
 0x2dd   : > { %1199 = vst.msk [vmem:[#allocation3 + $0x138] sm:$0xff] %vm495_vm0, %v1177_v56 }
 0x2de   : > { %v3754_v57 = vpop.permute.xlu1 %1170 }
 0x2e0   : > { %v1013_v58 = vpop.permute.xlu0 %1012  ;;  %v1455_v12 = vld [vmem:[#allocation3 + $0xf8] sm:$0xff] }
 0x2e1   : > { %v1021_v59 = vsel %vm505_vm1, %v1013_v58, %v1015_v49 }
 0x2e2   : > { %v1011_v60 = vpop.permute.xlu1 %1010  ;;  %1670 = vmatpush1.bf16.msra.mxu1 %v1021_v59 }
 0x2e3   : > { %v1019_v62 = vsel %vm505_vm1, %v1009_v50, %v1011_v60  ;;  %v1020_v63 = vsel %vm505_vm1, %v1011_v60, %v1013_v58  ;;  %1671 = vmatprep.subr.bf16.mxu1 %v1443_v61  ;;  %vm2405_vm1 = vcmask 1043456  }
 0x2e4   : > { %v3759_v0 = vpop.permute.xlu0 %1230  ;;  %1563 = vmatprep.subr.bf16.mxu0 %v1020_v63 }
 0x2e5   : > { %1253 = vst.msk [vmem:[#allocation3 + $0x178] sm:$0xff] %vm495_vm0, %v3759_v0  ;;  %1564 = vmatpush1.bf16.msra.mxu0 %v1019_v62  ;;  %v3151_v62 = vld [vmem:[%s4347_s3] ss:$12 sps:$4 sm:$0xff]  }
 0x2e6   : > { %v3763_v1 = vpop.permute.xlu1 %1224  ;;  %1565 = vmatprep.subr.bf16.mxu0 %v1071_v29  ;;  %1672 = vmatpush1.bf16.msra.mxu1 %v1072_v25  ;;  %v1463_v25 = vld [vmem:[#allocation3 + $0x138] sm:$0xff] }
 0x2e7   : > { %1673 = vmatprep.subr.bf16.mxu1 %v1447_v2 }
 0x2e8   : > { %v1067_v3 = vpop.permute.xlu0 %1066 }
 0x2e9   : > { %v1075_v4 = vsel %vm525_vm2, %v1067_v3, %v1069_v51  ;;  %1566 = vmatpush1.bf16.msra.mxu0 %v1070_v28 }
 0x2ea   : > { %v1065_v5 = vpop.permute.xlu1 %1064  ;;  %1674 = vmatpush1.bf16.msra.mxu1 %v1075_v4 }
 0x2eb   : > { %v1073_v7 = vsel %vm525_vm2, %v1063_v52, %v1065_v5  ;;  %v1074_v9 = vsel %vm525_vm2, %v1065_v5, %v1067_v3  ;;  %1675 = vmatprep.subr.bf16.mxu1 %v1451_v6  ;;  %vm2392_vm2 = vcmask 31744  }
 0x2ec   : > { %v1275_v10 = vpop.permute.xlu0 %1274  ;;  %1567 = vmatprep.subr.bf16.mxu0 %v1074_v9  ;;  %v3156_v9 = vld [vmem:[%s4347_s3 + $0x18] ss:$12 sps:$4 sm:$0xff]  }
 0x2ed   : > { %1568 = vmatpush1.bf16.msra.mxu0 %v1073_v7 }
 0x2ee   : > { %v1273_v11 = vpop.permute.xlu1 %1272  ;;  %1569 = vmatprep.subr.bf16.mxu0 %v1125_v34  ;;  %1676 = vmatpush1.bf16.msra.mxu1 %v3714_v24 }
 0x2ef   : > { %v1287_v13 = vsel %vm605_vm6, %v1273_v11, %v1275_v10  ;;  %1677 = vmatprep.subr.bf16.mxu1 %v1455_v12 }
 0x2f0   : > { %v1121_v14 = vpop.permute.xlu0 %1120 }
 0x2f1   : > { %v1129_v15 = vsel %vm545_vm3, %v1121_v14, %v1123_v53  ;;  %1570 = vmatpush1.bf16.msra.mxu0 %v3720_v33  ;;  %v1471_v33 = vld [vmem:[#allocation3 + $0x178] sm:$0xff] }
 0x2f2   : > { %v1119_v16 = vpop.permute.xlu1 %1118  ;;  %1678 = vmatpush1.bf16.msra.mxu1 %v1129_v15 }
 0x2f3   : > { %v1127_v18 = vsel %vm545_vm3, %v1117_v55, %v1119_v16  ;;  %v1128_v19 = vsel %vm545_vm3, %v1119_v16, %v1121_v14  ;;  %1679 = vmatprep.subr.bf16.mxu1 %v1459_v17  ;;  %v1935_v17 = vld [vmem:[%s4312_s12 + $0x80] sm:$0xff]  ;;  %vm2640_vm3 = vcmask 818176  }
 0x2f4   : > { %v1277_v21 = vpop.permute.xlu0 %1276  ;;  %1571 = vmatprep.subr.bf16.mxu0 %v1128_v19 }
 0x2f5   : > { %v1288_v22 = vsel %vm605_vm6, %v1275_v10, %v1277_v21  ;;  %1303 = vst.msk [vmem:[#allocation3 + $0x198] sm:$0xff] %vm495_vm0, %v1277_v21  ;;  %1572 = vmatpush1.bf16.msra.mxu0 %v1127_v18  ;;  %v1936_v18 = vld [vmem:[%s4312_s12 + $0x88] sm:$0xff] }
 0x2f6   : > { %v1271_v23 = vpop.permute.xlu1 %1270  ;;  %1573 = vmatprep.subr.bf16.mxu0 %v3736_v42  ;;  %1680 = vmatpush1.bf16.msra.mxu1 %v3727_v37  ;;  %v3157_v21 = vld [vmem:[%s4347_s3 + $0x8] ss:$12 sps:$4 sm:$0xff]  }
 0x2f7   : > { %v1286_v26 = vsel %vm605_vm6, %v1271_v23, %v1273_v11  ;;  %1681 = vmatprep.subr.bf16.mxu1 %v1463_v25  ;;  %v2983_v23 = vpack.c.bf16 %v1936_v18, %v1935_v17  ;;  %v1961_v17 = vld [vmem:[%s4312_s12 + $0x150] sm:$0xff]  ;;  %v1962_v18 = vld [vmem:[%s4312_s12 + $0x158] sm:$0xff] }
 0x2f8   : > { %v1175_v20 = vpop.permute.xlu0 %1174 }
 0x2f9   : > { %v1183_v28 = vsel %vm565_vm4, %v1175_v20, %v1177_v56  ;;  %1574 = vmatpush1.bf16.msra.mxu0 %v3733_v41 }
 0x2fa   : > { %v1173_v29 = vpop.permute.xlu1 %1172  ;;  %1682 = vmatpush1.bf16.msra.mxu1 %v1183_v28  ;;  %v3181_v28 = vld [vmem:[#allocation2 + $0x90] sm:$0xff] }
 0x2fb   : > { %v1181_v31 = vsel %vm565_vm4, %v3754_v57, %v1173_v29  ;;  %v1182_v24 = vsel %vm565_vm4, %v1173_v29, %v1175_v20  ;;  %1683 = vmatprep.subr.bf16.mxu1 %v1467_v30  ;;  %v3158_v20 = vld [vmem:[%s4347_s3 + $0x20] ss:$12 sps:$4 sm:$0xff]   ;;  %v3256_v29 = vmov 0.0|0.0   ;;  %vm2669_vm4 = vcmask 228352  }
 0x2fc   : > { %v1285_v32 = vpop.permute.xlu0 %1284  ;;  %1575 = vmatprep.subr.bf16.mxu0 %v1182_v24  ;;  %v1475_v37 = vld [vmem:[#allocation3 + $0x198] sm:$0xff]  ;;  %v1920_v30 = vld [vmem:[%s4312_s12 + $0x8] sm:$0xff] }
 0x2fd   : > { %1307 = vst.msk [vmem:[#allocation3 + $0x1b8] sm:$0xff] %vm495_vm0, %v1285_v32  ;;  %1576 = vmatpush1.bf16.msra.mxu0 %v1181_v31  ;;  %v1937_v31 = vld [vmem:[%s4312_s12 + $0x90] sm:$0xff]  ;;  %v1938_v24 = vld [vmem:[%s4312_s12 + $0x98] sm:$0xff] }
 0x2fe   : > { %v1279_v27 = vpop.permute.xlu1 %1278  ;;  %1577 = vmatprep.subr.bf16.mxu0 %v3748_v48  ;;  %1684 = vmatpush1.bf16.msra.mxu1 %v3739_v44 }
 0x2ff   : > { %1685 = vmatprep.subr.bf16.mxu1 %v1471_v33  ;;  %v2987_v33 = vpack.c.bf16 %v1938_v24, %v1937_v31  ;;  %v1949_v31 = vld [vmem:[%s4312_s12 + $0xf0] sm:$0xff]  ;;  %v1950_v24 = vld [vmem:[%s4312_s12 + $0xf8] sm:$0xff] }
 0x300   : > { %v1229_v34 = vpop.permute.xlu0 %1228 }
 0x301   : > { %v1237_v35 = vsel %vm585_vm5, %v1229_v34, %v3759_v0  ;;  %1578 = vmatpush1.bf16.msra.mxu0 %v3745_v47  ;;  %v3154_v0 = vld [vmem:[%s4347_s3 + $0x1c] ss:$12 sps:$4 sm:$0xff]   ;;  %s3259_s3 = smov 56  }
 0x302   : > { %v1227_v36 = vpop.permute.xlu1 %1226  ;;  %1686 = vmatpush1.bf16.msra.mxu1 %v1237_v35  ;;  %v1922_v35 = vld [vmem:[%s4312_s12 + $0x18] sm:$0xff] }
 0x303   : > { %v1235_v40 = vsel %vm585_vm5, %v3763_v1, %v1227_v36  ;;  %v1236_v38 = vsel %vm585_vm5, %v1227_v36, %v1229_v34  ;;  %1687 = vmatprep.subr.bf16.mxu1 %v1475_v37  ;;  %v1921_v34 = vld [vmem:[%s4312_s12 + $0x10] sm:$0xff]  ;;  %v1939_v36 = vld [vmem:[%s4312_s12 + $0xa0] sm:$0xff]  ;;  %v1940_v37 = vld [vmem:[%s4312_s12 + $0xa8] sm:$0xff]  ;;  %vm2703_vm5 = vcmask 457728  }
 0x304   : > { %v1329_v41 = vpop.permute.xlu0 %1328  ;;  %1579 = vmatprep.subr.bf16.mxu0 %v1236_v38  ;;  %v1479_v43 = vld [vmem:[#allocation3 + $0x1b8] sm:$0xff]  ;;  %v1952_v38 = vld [vmem:[%s4312_s12 + $0x108] sm:$0xff] }
 0x305   : > { %1580 = vmatpush1.bf16.msra.mxu0 %v1235_v40  ;;  %v1951_v40 = vld [vmem:[%s4312_s12 + $0x100] sm:$0xff] }
 0x306   : > { %v1327_v42 = vpop.permute.xlu1 %1326  ;;  %1581 = vmatprep.subr.bf16.mxu0 %v1287_v13  ;;  %1688 = vmatpush1.bf16.msra.mxu1 %v1288_v22  ;;  %v3179_v22 = vld [vmem:[#allocation2 + $0x88] sm:$0xff] }
 0x307   : > { %v1341_v44 = vsel %vm625_vm7, %v1327_v42, %v1329_v41  ;;  %1689 = vmatprep.subr.bf16.mxu1 %v1479_v43  ;;  %v1923_v43 = vld [vmem:[%s4312_s12 + $0x20] sm:$0xff] }
 0x308   : > { %v1283_v45 = vpop.permute.xlu0 %1282 }
 0x309   : > { %v1291_v46 = vsel %vm605_vm6, %v1283_v45, %v1285_v32  ;;  %1582 = vmatpush1.bf16.msra.mxu0 %v1286_v26  ;;  %v3180_v26 = vld [vmem:[#allocation2 + $0x80] sm:$0xff] }
 0x30a   : > { %v1281_v47 = vpop.permute.xlu1 %1280  ;;  %1690 = vmatpush1.bf16.msra.mxu1 %v1291_v46  ;;  %v3159_v32 = vld [vmem:[%s4305_s5] sm:$0xff]   ;;  %v1941_v46 = vld [vmem:[%s4312_s12 + $0xb0] sm:$0xff] }
 0x30b   : > { %v1289_v48 = vsel %vm605_vm6, %v1279_v27, %v1281_v47  ;;  %v1290_v49 = vsel %vm605_vm6, %v1281_v47, %v1283_v45  ;;  %v3016_v45 = vpack.c.bf16 %v1952_v38, %v1951_v40  ;;  %v1942_v47 = vld [vmem:[%s4312_s12 + $0xb8] sm:$0xff]  ;;  %vm2737_vm6 = vcmask 687104  }
 0x30c   : > { %v1331_v50 = vpop.permute.xlu0 %1330  ;;  %1583 = vmatprep.subr.bf16.mxu0 %v1290_v49  ;;  %v1953_v49 = vld [vmem:[%s4312_s12 + $0x110] sm:$0xff] }
 0x30d   : > { %v1342_v51 = vsel %vm625_vm7, %v1329_v41, %v1331_v50  ;;  %1357 = vst.msk [vmem:[#allocation3 + $0x1d8] sm:$0xff] %vm495_vm0, %v1331_v50  ;;  %1584 = vmatpush1.bf16.msra.mxu0 %v1289_v48  ;;  %v2989_v41 = vpack.c.bf16 %v1922_v35, %v1921_v34  ;;  %v3160_v48 = vld [vmem:[%s4305_s5 + $0x8] sm:$0xff]   ;;  %v1954_v50 = vld [vmem:[%s4312_s12 + $0x118] sm:$0xff]  ;;  %v1967_v35 = vld [vmem:[%s4312_s12 + $0x180] sm:$0xff] }
 0x30e   : > { %v1325_v52 = vpop.permute.xlu1 %1324  ;;  %1585 = vmatprep.subr.bf16.mxu0 %v1341_v44  ;;  %v1924_v44 = vld [vmem:[%s4312_s12 + $0x28] sm:$0xff] }
 0x30f   : > { %v1340_v53 = vsel %vm625_vm7, %v1325_v52, %v1327_v42  ;;  %v2991_v42 = vpack.c.bf16 %v1940_v37, %v1939_v36  ;;  %v2995_v52 = vpack.c.bf16 %v1942_v47, %v1941_v46  ;;  %v1968_v36 = vld [vmem:[%s4312_s12 + $0x188] sm:$0xff] }
 0x310   : > { %v1337_v54 = vpop.permute.xlu0 %1336  ;;  %v3040_v37 = vpack.c.bf16 %v1968_v36, %v1967_v35 }
 0x311   : > { %1586 = vmatpush1.bf16.msra.mxu0 %v1340_v53  ;;  %v1925_v53 = vld [vmem:[%s4312_s12 + $0x30] sm:$0xff] }
 0x312   : > { %v1335_v55 = vpop.permute.xlu1 %1334 }
 0x313   : > { %v1344_v56 = vsel %vm625_vm7, %v1335_v55, %v1337_v54 }
 0x314   : > { %v1339_v57 = vpop.permute.xlu0 %1338  ;;  %v1483_v58 = vld [vmem:[#allocation3 + $0x1d8] sm:$0xff]  ;;  %1587 = vmatprep.subr.bf16.mxu0 %v1344_v56  ;;  %v1943_v56 = vld [vmem:[%s4312_s12 + $0xc0] sm:$0xff] }
 0x315   : > { %v1345_v59 = vsel %vm625_vm7, %v1337_v54, %v1339_v57  ;;  %1361 = vst.msk [vmem:[#allocation3 + $0x1f8] sm:$0xff] %vm495_vm0, %v1339_v57  ;;  %1691 = vmatprep.subr.bf16.mxu1 %v1483_v58  ;;  %v1926_v54 = vld [vmem:[%s4312_s12 + $0x38] sm:$0xff]  ;;  %v1944_v57 = vld [vmem:[%s4312_s12 + $0xc8] sm:$0xff]  ;;  %v1955_v58 = vld [vmem:[%s4312_s12 + $0x120] sm:$0xff] }
 0x316   : > { %1692 = vmatpush1.bf16.msra.mxu1 %v1342_v51  ;;  %v1333_v60 = vpop.permute.xlu1 %1332  ;;  %v2993_v51 = vpack.c.bf16 %v1924_v44, %v1923_v43 }
 0x317   : > { %v1343_v61 = vsel %vm625_vm7, %v1333_v60, %v1335_v55  ;;  %v3019_v55 = vpack.c.bf16 %v1954_v50, %v1953_v49  ;;  %v2999_v60 = vpack.c.bf16 %v1944_v57, %v1943_v56 }
 0x318   : > { %v1383_v63 = vpop.permute.xlu0 %1382  ;;  %1588 = vmatpush1.bf16.msra.mxu0 %v1343_v61  ;;  %v1927_v61 = vld [vmem:[%s4312_s12 + $0x40] sm:$0xff] }
 0x31a   : > { %v1381_v1 = vpop.permute.xlu1 %1380 }
 0x31b   : > { %v1395_v2 = vsel %vm645_vm8, %v1381_v1, %v1383_v63  ;;  %1590 = vmatmul.mubr.bf16.vlgmr.msra.gmra.mrb[8].mxu0 %v3151_v62 }
 0x31c   : > { %v1385_v3 = vpop.permute.xlu0 %1384  ;;  %v1487_v4 = vld [vmem:[#allocation3 + $0x1f8] sm:$0xff]  ;;  %1610 = vmatprep.subr.bf16.mxu0 %v1395_v2  ;;  %1599 = vmatprep.mubr.bf16.mxu0 %v3154_v0  ;;  %v1957_v2 = vld [vmem:[%s4312_s12 + $0x130] sm:$0xff] }
 0x31d   : > { %v1396_v5 = vsel %vm645_vm8, %v1383_v63, %v1385_v3  ;;  %1411 = vst.msk [vmem:[#allocation3 + $0x218] sm:$0xff] %vm495_vm0, %v1385_v3  ;;  %1693 = vmatprep.subr.bf16.mxu1 %v1487_v4  ;;  %v1958_v3 = vld [vmem:[%s4312_s12 + $0x138] sm:$0xff] }
 0x31e   : > { %1694 = vmatpush1.bf16.msra.mxu1 %v1345_v59  ;;  %v1379_v6 = vpop.permute.xlu1 %1378  ;;  %v2997_v59 = vpack.c.bf16 %v1926_v54, %v1925_v53 }
 0x31f   : > { %v1394_v7 = vsel %vm645_vm8, %v1379_v6, %v1381_v1  ;;  %v1946_v1 = vld [vmem:[%s4312_s12 + $0xd8] sm:$0xff]  ;;  %v1929_v6 = vld [vmem:[%s4312_s12 + $0x50] sm:$0xff] }
 0x320   : > { %v1391_v10 = vpop.permute.xlu0 %1390  ;;  %1611 = vmatpush1.bf16.msra.mxu0 %v1394_v7  ;;  %v1930_v7 = vld [vmem:[%s4312_s12 + $0x58] sm:$0xff] }
 0x321   : > { %1696 = vmatmul.mubr.bf16.vlgmr.msra.gmra.mrb[8].mxu1 %v3151_v62  ;;  %v1928_v62 = vld [vmem:[%s4312_s12 + $0x48] sm:$0xff] }
 0x322   : > { %v1389_v11 = vpop.permute.xlu1 %1388  ;;  %1705 = vmatprep.mubr.bf16.mxu1 %v3154_v0  ;;  %v1945_v0 = vld [vmem:[%s4312_s12 + $0xd0] sm:$0xff]  ;;  %v3001_v4 = vpack.c.bf16 %v1928_v62, %v1927_v61 }
 0x323   : > { %v1398_v12 = vsel %vm645_vm8, %v1389_v11, %v1391_v10  ;;  %1600 = vmatmul.mubr.bf16.gmra.mrb[12].mxu0 %v3156_v9 }
 0x324   : > { %v1393_v13 = vpop.permute.xlu0 %1392  ;;  %v1491_v14 = vld [vmem:[#allocation3 + $0x218] sm:$0xff]  ;;  %1612 = vmatprep.subr.bf16.mxu0 %v1398_v12  ;;  %1642 = vmatprep.mubr.bf16.mxu0 %v3254_v8  ;;  %v1959_v12 = vld [vmem:[%s4312_s12 + $0x140] sm:$0xff] }
 0x325   : > { %v1399_v15 = vsel %vm645_vm8, %v1391_v10, %v1393_v13  ;;  %1415 = vst.msk [vmem:[#allocation3 + $0x238] sm:$0xff] %vm495_vm0, %v1393_v13  ;;  %1716 = vmatprep.subr.bf16.mxu1 %v1491_v14  ;;  %v1947_v10 = vld [vmem:[%s4312_s12 + $0xe0] sm:$0xff]  ;;  %v1960_v13 = vld [vmem:[%s4312_s12 + $0x148] sm:$0xff]  ;;  %v3005_v14 = vpack.c.bf16 %v1930_v7, %v1929_v6 }
 0x326   : > { %1717 = vmatpush1.bf16.msra.mxu1 %v1396_v5  ;;  %v1387_v16 = vpop.permute.xlu1 %1386  ;;  %v3003_v5 = vpack.c.bf16 %v1946_v1, %v1945_v0 }
 0x327   : > { %v1397_v19 = vsel %vm645_vm8, %v1387_v16, %v1389_v11  ;;  %v1948_v11 = vld [vmem:[%s4312_s12 + $0xe8] sm:$0xff]  ;;  %v3028_v16 = vpack.c.bf16 %v1960_v13, %v1959_v12 }
 0x328   : > { %1613 = vmatpush1.bf16.msra.mxu0 %v1397_v19  ;;  %v3031_v19 = vpack.c.bf16 %v1962_v18, %v1961_v17 }
 0x329   : > { %1706 = vmatmul.mubr.bf16.gmra.mrb[12].mxu1 %v3156_v9  ;;  %1813 = vmatprep.subr.bf16.mxu0 %v3179_v22  ;;  %v3025_v9 = vpack.c.bf16 %v1958_v3, %v1957_v2  ;;  %v1964_v22 = vld [vmem:[%s4312_s12 + $0x168] sm:$0xff] }
 0x32a   : > { %1748 = vmatprep.mubr.bf16.mxu1 %v3254_v8 }
 0x32b   : > { %2853 = vmatmul.mubr.msk.bf16.vlgmr.msra.gmra.mrb[8].mxu0 %vm1550_vm13, %v3157_v21 }
 0x32c   : > { %v1495_v25 = vld [vmem:[#allocation3 + $0x238] sm:$0xff]  ;;  %1814 = vmatpush1.bf16.msra.mxu0 %v3180_v26  ;;  %1652 = vmatprep.mubr.bf16.mxu0 %v3254_v8 }
 0x32d   : > { %1718 = vmatprep.subr.bf16.mxu1 %v1495_v25  ;;  %2984 = vmatprep.subr.bf16.mxu0 %v2983_v23  ;;  %v1965_v25 = vld [vmem:[%s4312_s12 + $0x170] sm:$0xff]  ;;  %v1966_v26 = vld [vmem:[%s4312_s12 + $0x178] sm:$0xff] }
 0x32e   : > { %1719 = vmatpush1.bf16.msra.mxu1 %v1399_v15  ;;  %v3007_v15 = vpack.c.bf16 %v1948_v11, %v1947_v10 }
 0x32f   : > { %1866 = vmatprep.subr.bf16.mxu1 %v3459_v39  ;;  %v1919_v39 = vld [vmem:[%s4312_s12] sm:$0xff] }
 0x330   : > { %v2985_v27 = vpack.c.bf16 %v1920_v30, %v1919_v39  ;;  %v1932_v39 = vld [vmem:[%s4312_s12 + $0x68] sm:$0xff] }
 0x331   : > { %2855 = vmatmul.mubr.msk.bf16.vlgmr.msra.gmra.mrb[8].mxu1 %vm1550_vm13, %v3157_v21  ;;  %v1963_v21 = vld [vmem:[%s4312_s12 + $0x160] sm:$0xff] }
 0x332   : > { %1867 = vmatpush1.bf16.msra.mxu1 %v3181_v28  ;;  %1758 = vmatprep.mubr.bf16.mxu1 %v3254_v8  ;;  %v3034_v23 = vpack.c.bf16 %v1964_v22, %v1963_v21  ;;  %v1931_v28 = vld [vmem:[%s4312_s12 + $0x60] sm:$0xff] }
 0x333   : > { %2854 = vmatmul.mubr.msk.bf16.gmra.mrb[12].mxu0 %vm1550_vm13, %v3158_v20  ;;  %3015 = vmatprep.subr.bf16.mxu1 %v3256_v29  ;;  %v3009_v30 = vpack.c.bf16 %v1932_v39, %v1931_v28  ;;  %v3258_v39 = vmov 0.0  }
 0x334   : > { %1845 = vmatprep.mubr.bf16.mxu0 %v3254_v8 }
 0x335   : > { %v1508_v44 = vpop.permute.xlu0 %1507 }
 0x337   : > { %v1503_v38 = vpop.permute.xlu1 %1502 }
 0x339   : > { %2856 = vmatmul.mubr.msk.bf16.gmra.mrb[12].mxu1 %vm1550_vm13, %v3158_v20  ;;  %v3037_v20 = vpack.c.bf16 %v1966_v26, %v1965_v25 }
 0x33a   : > { %1898 = vmatprep.mubr.bf16.mxu1 %v3254_v8 }
 0x33b   : > { %2859 = vmatmul.mubr.msk.bf16.vlgmr.msra.gmra.mrb[16].mxu0 %vm495_vm0, %v3159_v32  ;;  %v1513_v49 = vpop.permute.xlu1 %1512 }
 0x33c   : > { %1855 = vmatprep.mubr.bf16.mxu0 %v3254_v8  ;;  %2986 = vmatpush3.bf16.msra.mxu0 %v2985_v27  ;;  %v1933_v27 = vld [vmem:[%s4312_s12 + $0x70] sm:$0xff] }
 0x33d   : > { %2988 = vmatprep.subr.bf16.mxu0 %v2987_v33  ;;  %v1934_v33 = vld [vmem:[%s4312_s12 + $0x78] sm:$0xff] }
 0x33e   : > { %v3013_v34 = vpack.c.bf16 %v1934_v33, %v1933_v27 }
 0x340   : > { %2990 = vmatpush3.bf16.msra.mxu0 %v2989_v41 }
 0x341   : > { %2861 = vmatmul.mubr.msk.bf16.vlgmr.msra.gmra.mrb[16].mxu1 %vm495_vm0, %v3159_v32  ;;  %2992 = vmatprep.subr.bf16.mxu0 %v2991_v42  ;;  %v3011_v32 = vpack.c.bf16 %v1950_v24, %v1949_v31 }
 0x342   : > { %1908 = vmatprep.mubr.bf16.mxu1 %v3254_v8  ;;  %3017 = vmatpush1.bf16.msra.mxu1 %v3016_v45  ;;  %v1956_v8 = vld [vmem:[%s4312_s12 + $0x128] sm:$0xff] }
 0x343   : > { %2860 = vmatmul.mubr.msk.bf16.gmra.mrb[20].mxu0 %vm495_vm0, %v3160_v48  ;;  %3018 = vmatprep.subr.bf16.mxu1 %v3256_v29  ;;  %v3022_v63 = vpack.c.bf16 %v1956_v8, %v1955_v58 }
 0x344   : > { %2994 = vmatpush3.bf16.msra.mxu0 %v2993_v51 }
 0x345   : > { %2996 = vmatprep.subr.bf16.mxu0 %v2995_v52 }
 0x346   : > { %3020 = vmatpush1.bf16.msra.mxu1 %v3019_v55 }
 0x347   : > { %3021 = vmatprep.subr.bf16.mxu1 %v3256_v29 }
 0x348   : > { %2998 = vmatpush3.bf16.msra.mxu0 %v2997_v59 }
 0x349   : > { %2862 = vmatmul.mubr.msk.bf16.gmra.mrb[20].mxu1 %vm495_vm0, %v3160_v48  ;;  %3000 = vmatprep.subr.bf16.mxu0 %v2999_v60  ;;  %v1518_v60 = vpop.permute.xlu0 %1517 }
 0x34a   : > { %3023 = vmatpush1.bf16.msra.mxu1 %v3022_v63 }
 0x34b   : > { %3024 = vmatprep.subr.bf16.mxu1 %v3256_v29 }
 0x34c   : > { %3002 = vmatpush3.bf16.msra.mxu0 %v3001_v4 }
 0x34d   : > { %3004 = vmatprep.subr.bf16.mxu0 %v3003_v5 }
 0x34e   : > { %3026 = vmatpush1.bf16.msra.mxu1 %v3025_v9 }
 0x34f   : > { %3027 = vmatprep.subr.bf16.mxu1 %v3256_v29 }
 0x350   : > { %3006 = vmatpush3.bf16.msra.mxu0 %v3005_v14 }
 0x351   : > { %3008 = vmatprep.subr.bf16.mxu0 %v3007_v15 }
 0x352   : > { %3029 = vmatpush1.bf16.msra.mxu1 %v3028_v16 }
 0x353   : > { %3030 = vmatprep.subr.bf16.mxu1 %v3256_v29 }
 0x354   : > { %3010 = vmatpush3.bf16.msra.mxu0 %v3009_v30 }
 0x355   : > { %3012 = vmatprep.subr.bf16.mxu0 %v3011_v32 }
 0x356   : > { %3032 = vmatpush1.bf16.msra.mxu1 %v3031_v19 }
 0x357   : > { %3033 = vmatprep.subr.bf16.mxu1 %v3256_v29 }
 0x358   : > { %3014 = vmatpush3.bf16.msra.mxu0 %v3013_v34 }
 0x35a   : > { %3035 = vmatpush1.bf16.msra.mxu1 %v3034_v23 }
 0x35b   : > { %3036 = vmatprep.subr.bf16.mxu1 %v3256_v29 }
 0x35e   : > { %3038 = vmatpush1.bf16.msra.mxu1 %v3037_v20 }
 0x35f   : > { %3039 = vmatprep.subr.bf16.mxu1 %v3256_v29 }
 0x362   : > { %3041 = vmatpush1.bf16.msra.mxu1 %v3040_v37 }
 0x363   : > { %3042 = vmatprep.subr.bf16.mxu1 %v3256_v29 }
 0x3fe   : > { %v1644_v40 = vpop.f32.mrb[8].mxu0 }
 0x3ff   : > { %v1646_v41 = vpop.f32.mrb[9].mxu0  ;;  %v4012_v45 = vadd.f32 %v1644_v40, %v1503_v38 }
 0x400   : > { %v4010_v42 = vadd.f32 %v1646_v41, %v1503_v38  ;;  %v1648_v43 = vpop.f32.mrb[10].mxu0 }
 0x401   : > { %v1650_v46 = vpop.f32.mrb[11].mxu0  ;;  %v4019_v51 = vadd.f32 %v1648_v43, %v1508_v44 }
 0x402   : > { %v4014_v47 = vadd.f32 %v1650_v46, %v1508_v44  ;;  %2045 = vmatprep.mubr.f32.mxu0 %v4010_v42 }
 0x403   : > { %2046 = vmatmul.mubr.f32.vlgmr.msra.gmra.mrb[24].mxu0 %v4012_v45 }
 0x404   : > { %v1750_v48 = vpop.f32.mrb[8].mxu1  ;;  %2050 = vmatprep.mubr.f32.mxu0 %v4014_v47 }
 0x405   : > { %v1752_v50 = vpop.f32.mrb[9].mxu1  ;;  %v4023_v55 = vadd.f32 %v1750_v48, %v1503_v38 }
 0x406   : > { %v4021_v52 = vadd.f32 %v1752_v50, %v1503_v38  ;;  %v1754_v53 = vpop.f32.mrb[10].mxu1  ;;  %v1654_v54 = vpop.f32.mrb[12].mxu0 }
 0x407   : > { %v1756_v56 = vpop.f32.mrb[11].mxu1  ;;  %v1656_v57 = vpop.f32.mrb[13].mxu0  ;;  %2051 = vmatmul.mubr.f32.gmra.mrb[26].mxu0 %v4019_v51  ;;  %v4033_v61 = vadd.f32 %v1654_v54, %v1513_v49  ;;  %v4040_v0 = vadd.f32 %v1754_v53, %v1508_v44 }
 0x408   : > { %v4026_v58 = vadd.f32 %v1756_v56, %v1508_v44  ;;  %2863 = vmatprep.mubr.msk.f32.mxu1 %vm495_vm0, %v4021_v52  ;;  %v4030_v8 = vadd.f32 %v1656_v57, %v1513_v49  ;;  %v1658_v59 = vpop.f32.mrb[14].mxu0 }
 0x409   : > { %2131 = vmatmul.mubr.f32.vlgmr.msra.gmra.mrb[24].mxu1 %v4023_v55  ;;  %v1660_v62 = vpop.f32.mrb[15].mxu0  ;;  %v4045_v3 = vadd.f32 %v1658_v59, %v1518_v60 }
 0x40a   : > { %2864 = vmatprep.mubr.msk.f32.mxu1 %vm495_vm0, %v4026_v58  ;;  %v4037_v63 = vadd.f32 %v1660_v62, %v1518_v60  ;;  %2055 = vmatprep.mubr.f32.mxu0 %v4030_v8 }
 0x40b   : > { %2056 = vmatmul.mubr.f32.gmra.mrb[28].mxu0 %v4033_v61 }
 0x40c   : > { %v1760_v1 = vpop.f32.mrb[12].mxu1  ;;  %2060 = vmatprep.mubr.f32.mxu0 %v4037_v63 }
 0x40d   : > { %v1762_v2 = vpop.f32.mrb[13].mxu1  ;;  %2136 = vmatmul.mubr.f32.gmra.mrb[26].mxu1 %v4040_v0  ;;  %v4051_v7 = vadd.f32 %v1760_v1, %v1513_v49  ;;  %v2151_v1 = vld [vmem:[%s4307_s7] sm:$0x3] }
 0x40e   : > { %v4047_v4 = vadd.f32 %v1762_v2, %v1513_v49  ;;  %v1764_v5 = vpop.f32.mrb[14].mxu1  ;;  %v4049_v6 = vpop.f32.mrb[16].mxu0  ;;  %v2232_v2 = vld [vmem:[%s4309_s9] sm:$0xff] }
 0x40f   : > { %v1766_v9 = vpop.f32.mrb[15].mxu1  ;;  %v4053_v10 = vpop.f32.mrb[17].mxu0  ;;  %2061 = vmatmul.mubr.f32.gmra.mrb[30].mxu0 %v4045_v3  ;;  %v4067_v14 = vadd.f32 %v1764_v5, %v1518_v60 }
 0x410   : > { %v4056_v11 = vadd.f32 %v1766_v9, %v1518_v60  ;;  %2865 = vmatprep.mubr.msk.f32.mxu1 %vm495_vm0, %v4047_v4  ;;  %v4060_v12 = vpop.f32.mrb[18].mxu0  ;;  %2977 = vmatprep.mubr.msk.f32.mxu0 %vm2260_vm15, %v2232_v2 }
 0x411   : > { %2141 = vmatmul.mubr.f32.gmra.mrb[28].mxu1 %v4051_v7  ;;  %v4063_v13 = vpop.f32.mrb[19].mxu0 }
 0x412   : > { %2866 = vmatprep.mubr.msk.f32.mxu1 %vm495_vm0, %v4056_v11  ;;  %vm2273_vm0 = vcmask 1041408  }
 0x414   : > { %v4069_v15 = vpop.f32.mrb[16].mxu1 }
 0x415   : > { %v4071_v16 = vpop.f32.mrb[17].mxu1  ;;  %2146 = vmatmul.mubr.f32.gmra.mrb[30].mxu1 %v4067_v14 }
 0x416   : > { %v4074_v17 = vpop.f32.mrb[18].mxu1  ;;  %v4076_v18 = vpop.f32.mrb[20].mxu0  ;;  %2972 = vmatprep.mubr.msk.f32.mxu1 %vm3257_vm14, %v3258_v39 }
 0x417   : > { %v4078_v19 = vpop.f32.mrb[19].mxu1  ;;  %v4080_v21 = vpop.f32.mrb[21].mxu0 }
 0x418   : > { %v4082_v22 = vpop.f32.mrb[22].mxu0 }
 0x419   : > { %v4084_v23 = vpop.f32.mrb[23].mxu0 }
 0x41c   : > { %v4086_v25 = vpop.f32.mrb[20].mxu1 }
 0x41d   : > { %v4088_v26 = vpop.f32.mrb[21].mxu1 }
 0x41e   : > { %v4090_v20 = vpop.f32.mrb[22].mxu1 }
 0x41f   : > { %v4092_v28 = vpop.f32.mrb[23].mxu1 }
 0x4d6   : > { %v2942_v30 = vpop.f32.mrb[24].mxu0 }
 0x4d7   : > { %v2943_v31 = vpop.f32.mrb[25].mxu0 }
 0x4d8   : > { %v2944_v24 = vadd.f32 %v2943_v31, %v2942_v30 }
 0x4da   : > { %v2945_v32 = vpop.f32.mrb[26].mxu0 }
 0x4db   : > { %v2946_v27 = vpop.f32.mrb[27].mxu0 }
 0x4dc   : > { %v2132_v33 = vpop.f32.mrb[24].mxu1  ;;  %v2947_v34 = vadd.f32 %v2946_v27, %v2945_v32  ;;  %v2234_v32 = vld [vmem:[%s4309_s9 + $0x10] sm:$0xff]  ;;  %v2235_v27 = vld [vmem:[%s4309_s9 + $0x18] sm:$0xff] }
 0x4dd   : > { %v2134_v35 = vpop.f32.mrb[25].mxu1  ;;  %v2133_v36 = vadd.f32 %v2944_v24, %v2132_v33  ;;  %v2233_v24 = vld [vmem:[%s4309_s9 + $0x8] sm:$0xff]  ;;  %v2386_v33 = vld [vmem:[%s4313_s13] sm:$0xff] }
 0x4de   : > { %v2948_v37 = vpop.f32.mrb[28].mxu0  ;;  %v2390_v35 = vcombine.high %v2386_v33, %v2386_v33 }
 0x4df   : > { %v2949_v40 = vpop.f32.mrb[29].mxu0 }
 0x4e0   : > { %v2137_v38 = vpop.f32.mrb[26].mxu1  ;;  %v2950_v41 = vadd.f32 %v2949_v40, %v2948_v37  ;;  %v2243_v37 = vpop.permute.xlu0 %2242 }
 0x4e1   : > { %v2139_v43 = vpop.f32.mrb[27].mxu1  ;;  %v2138_v44 = vadd.f32 %v2947_v34, %v2137_v38  ;;  %v2387_v34 = vld [vmem:[%s4313_s13 + $0x8] sm:$0xff] }
 0x4e2   : > { %v2951_v46 = vpop.f32.mrb[30].mxu0 }
 0x4e3   : > { %v3043_v48 = vpack.c.bf16 %v2138_v44, %v2133_v36  ;;  %v2952_v49 = vpop.f32.mrb[31].mxu0  ;;  %v2391_v36 = vcombine.high %v2387_v34, %v2387_v34 }
 0x4e4   : > { %v2142_v50 = vpop.f32.mrb[28].mxu1  ;;  %v2953_v53 = vadd.f32 %v2952_v49, %v2951_v46 }
 0x4e5   : > { %v2144_v54 = vpop.f32.mrb[29].mxu1  ;;  %v2143_v56 = vadd.f32 %v2950_v41, %v2142_v50  ;;  %3044 = vmatpush3.bf16.msra.mxu1 %v3043_v48  ;;  %v2253_v48 = vpop.permute.xlu0 %2252 }
 0x4e6   : > { %3045 = vmatprep.subr.bf16.mxu1 %v3256_v29  ;;  %v2156_v29 = vpop.permute.xlu1 %2155 }
 0x4e8   : > { %v2147_v57 = vpop.f32.mrb[30].mxu1 }
 0x4e9   : > { %v2149_v59 = vpop.f32.mrb[31].mxu1  ;;  %v2148_v60 = vadd.f32 %v2953_v53, %v2147_v57 }
 0x4ea   : > { %v2248_v40 = vpop.permute.xlu1 %2247 }
 0x4eb   : > { %v3046_v62 = vpack.c.bf16 %v2148_v60, %v2143_v56 }
 0x4ed   : > { %3047 = vmatpush3.bf16.msra.mxu1 %v3046_v62 }
 0x4ee   : > { %2877 = vmatprep.subr.msk.mxu1 %vm2405_vm1, %v2390_v35  ;;  %v2258_v53 = vpop.permute.xlu1 %2257 }
 0x4f0   : > { %2973 = vmatmul.mubr.msk.f32.vlgmr.msra.gmra.mrb[32].mxu1 %vm1550_vm13, %v2151_v1 }
 0x4f1   : > { %2478 = vmatprep.mubr.f32.mxu1 %v3258_v39  ;;  %2878 = vmatpush1.msk.msra.mxu1 %vm2405_vm1, %v2386_v33 }
 0x5c3   : > { %v2227_v5 = vpop.f32.mrb[32].mxu1 }
 0x5c4   : > { %v2228_v9 = vadd.f32 %v2227_v5, %v2156_v29  ;;  %v2974_v30 = vpop.f32.mrb[33].mxu1 }
 0x5c6   : > { %v2231_v31 = vmax.f32 %v2228_v9, 0.0 }
 0x5c8   : > { %2975 = vmatprep.subr.msk.mxu0 %vm2273_vm0, %v2231_v31 }
 0x5c9   : > { %2976 = vmatpush3.msk.msra.mxu0 %vm2273_vm0, %v2231_v31 }
 0x5ca   : > { %2978 = vmatmul.mubr.msk.f32.vlgmr.msra.gmra.mrb[32].mxu0 %vm2260_vm15, %v2233_v24  ;;  %2883 = vmatprep.subr.msk.mxu0 %vm2405_vm1, %v2391_v36 }
 0x5cb   : > { %2980 = vmatprep.mubr.msk.f32.mxu0 %vm2260_vm15, %v2234_v32  ;;  %2884 = vmatpush1.msk.msra.mxu0 %vm2405_vm1, %v2387_v34  ;;  %v1780_v34 = vpop.permute.xlu0 %1779 }
 0x5ce   : > { %2981 = vmatmul.mubr.msk.f32.gmra.mrb[34].mxu0 %vm2260_vm15, %v2235_v27 }
 0x5cf   : > { %2567 = vmatprep.mubr.f32.mxu0 %v3258_v39 }
 0x69d   : > { %v2979_v38 = vpop.f32.mrb[32].mxu0 }
 0x69e   : > { %v2349_v41 = vadd.f32 %v2979_v38, %v2248_v40  ;;  %v2343_v43 = vpop.f32.mrb[33].mxu0  ;;  %v1848_v40 = vadd.f32 %v4049_v6, %v1780_v34 }
 0x69f   : > { %v2344_v44 = vadd.f32 %v2343_v43, %v2243_v37  ;;  %v1901_v37 = vadd.f32 %v4069_v15, %v1780_v34 }
 0x6a0   : > { %v2874_v46 = vmul.f32 -1.442695, %v2349_v41 }
 0x6a1   : > { %v2873_v49 = vmul.f32 -1.442695, %v2344_v44  ;;  %v2982_v50 = vpop.f32.mrb[34].mxu0  ;;  %v1785_v44 = vpop.permute.xlu1 %1784 }
 0x6a2   : > { %3163 = vpow2.f32 %v2874_v46  ;;  %v2353_v54 = vpop.f32.mrb[35].mxu0  ;;  %v2359_v56 = vadd.f32 %v2982_v50, %v2258_v53  ;;  %v1903_v46 = vadd.f32 %v4071_v16, %v1780_v34  ;;  %v1852_v53 = vadd.f32 %v4060_v12, %v1785_v44 }
 0x6a3   : > { %3165 = vpow2.f32 %v2873_v49  ;;  %v2354_v57 = vadd.f32 %v2353_v54, %v2253_v48  ;;  %v1850_v48 = vadd.f32 %v4053_v10, %v1780_v34  ;;  %v1905_v6 = vadd.f32 %v4074_v17, %v1785_v44 }
 0x6a4   : > { %v2876_v60 = vmul.f32 -1.442695, %v2359_v56  ;;  %v1854_v17 = vadd.f32 %v4063_v13, %v1785_v44 }
 0x6a5   : > { %v2875_v59 = vmul.f32 -1.442695, %v2354_v57 }
 0x6a7   : > { %3167 = vpow2.f32 %v2875_v59 }
 0x6a8   : > { %3169 = vpow2.f32 %v2876_v60  ;;  %v1907_v60 = vadd.f32 %v4078_v19, %v1785_v44 }
 0x6ac   : > { %v3164_v62 = vpop.eup %3163 }
 0x6ad   : > { %v3166_v1 = vpop.eup %3165  ;;  %v2375_v29 = vadd.f32 1.0, %v3164_v62 }
 0x6ae   : > { %v2374_v2 = vadd.f32 1.0, %v3166_v1 }
 0x6b0   : > { %3171 = vrcp.f32 %v2374_v2  ;;  %v1790_v2 = vpop.permute.xlu0 %1789 }
 0x6b1   : > { %v3168_v5 = vpop.eup %3167  ;;  %3173 = vrcp.f32 %v2375_v29 }
 0x6b2   : > { %v2376_v9 = vadd.f32 1.0, %v3168_v5  ;;  %v3170_v30 = vpop.eup %3169 }
 0x6b3   : > { %v2377_v31 = vadd.f32 1.0, %v3170_v30 }
 0x6b4   : > { %3175 = vrcp.f32 %v2376_v9 }
 0x6b5   : > { %3177 = vrcp.f32 %v2377_v31 }
 0x6ba   : > { %v3172_v24 = vpop.eup %3171 }
 0x6bb   : > { %2879 = vmatmul.mubr.msk.f32.vlgmr.msra.gmra.mrb[34].mxu1 %vm2392_vm2, %v3172_v24  ;;  %2885 = vmatmul.mubr.msk.f32.vlgmr.msra.gmra.mrb[36].mxu0 %vm2392_vm2, %v3172_v24  ;;  %v3174_v32 = vpop.eup %3173 }
 0x6bc   : > { %2484 = vmatprep.mubr.f32.mxu1 %v3258_v39  ;;  %2573 = vmatprep.mubr.f32.mxu0 %v3258_v39 }
 0x6be   : > { %v3176_v27 = vpop.eup %3175 }
 0x6bf   : > { %2880 = vmatmul.mubr.msk.f32.gmra.mrb[36].mxu1 %vm2392_vm2, %v3174_v32  ;;  %2886 = vmatmul.mubr.msk.f32.gmra.mrb[38].mxu0 %vm2392_vm2, %v3174_v32  ;;  %v3178_v33 = vpop.eup %3177 }
 0x6c0   : > { %2490 = vmatprep.mubr.f32.mxu1 %v3258_v39  ;;  %2579 = vmatprep.mubr.f32.mxu0 %v3258_v39 }
 0x6c3   : > { %2881 = vmatmul.mubr.msk.f32.gmra.mrb[38].mxu1 %vm2392_vm2, %v3176_v27  ;;  %2887 = vmatmul.mubr.msk.f32.gmra.mrb[40].mxu0 %vm2392_vm2, %v3176_v27 }
 0x6c4   : > { %2496 = vmatprep.mubr.f32.mxu1 %v3258_v39  ;;  %2585 = vmatprep.mubr.f32.mxu0 %v3258_v39 }
 0x6c7   : > { %2882 = vmatmul.mubr.msk.f32.gmra.mrb[40].mxu1 %vm2392_vm2, %v3178_v33  ;;  %2888 = vmatmul.mubr.msk.f32.gmra.mrb[42].mxu0 %vm2392_vm2, %v3178_v33  ;;  %v1913_v33 = vadd.f32 %v4088_v26, %v1790_v2 }
 0x78e   : > { %v2480_v35 = vpop.f32.mrb[34].mxu1  ;;  %v2569_v36 = vpop.f32.mrb[36].mxu0 }
 0x78f   : > { %v2592_v38 = vmul.f32 %v4012_v45, %v2480_v35  ;;  %v2594_v39 = vmul.f32 %v4023_v55, %v2569_v36  ;;  %v2482_v41 = vpop.f32.mrb[35].mxu1  ;;  %v2571_v43 = vpop.f32.mrb[37].mxu0 }
 0x790   : > { %v2593_v49 = vmul.f32 %v4010_v42, %v2482_v41  ;;  %v2595_v50 = vmul.f32 %v4021_v52, %v2571_v43  ;;  %v1795_v35 = vpop.permute.xlu1 %1794 }
 0x791   : > { %v2608_v15 = vadd.f32 %v2592_v38, %v1848_v40  ;;  %v2610_v54 = vadd.f32 %v2594_v39, %v1901_v37 }
 0x792   : > { %v4149_v45 = vadd.f32 %v2593_v49, %v1850_v48  ;;  %v4151_v55 = vadd.f32 %v2595_v50, %v1903_v46  ;;  %v2486_v56 = vpop.f32.mrb[36].mxu1  ;;  %v2575_v16 = vpop.f32.mrb[38].mxu0  ;;  %v1917_v46 = vadd.f32 %v4092_v28, %v1795_v35 }
 0x793   : > { %v2624_v57 = vmax.f32 %v2608_v15, 0.0  ;;  %v2626_v10 = vmax.f32 %v2610_v54, 0.0  ;;  %v2596_v42 = vmul.f32 %v4019_v51, %v2486_v56  ;;  %v2598_v52 = vmul.f32 %v4040_v0, %v2575_v16  ;;  %v2488_v59 = vpop.f32.mrb[37].mxu1  ;;  %v2577_v12 = vpop.f32.mrb[39].mxu0 }
 0x794   : > { %v2597_v62 = vmul.f32 %v4014_v47, %v2488_v59  ;;  %v2599_v1 = vmul.f32 %v4026_v58, %v2577_v12  ;;  %v1911_v0 = vadd.f32 %v4086_v25, %v1790_v2  ;;  %v1858_v47 = vadd.f32 %v4076_v18, %v1790_v2 }
 0x795   : > { %2641 = vst.msk [vmem:[%s4160_s20] sm:$0xff] %vm2640_vm3, %v2624_v57  ;;  %v2612_v29 = vadd.f32 %v2596_v42, %v1852_v53  ;;  %v2614_v51 = vadd.f32 %v2598_v52, %v1905_v6  ;;  %2689 = vrot.lane.b32.xlu1 %v2626_v10, %s3259_s3  ;;  %2653 = vrot.lane.b32.xlu0 %v2624_v57, %s3260_s27  ;;  %v2625_v9 = vmax.f32 %v4149_v45, 0.0 }
 0x796   : > { %v2613_v58 = vadd.f32 %v2597_v62, %v1854_v17  ;;  %v2615_v13 = vadd.f32 %v2599_v1, %v1907_v60  ;;  %v2492_v19 = vpop.f32.mrb[38].mxu1  ;;  %v2581_v5 = vpop.f32.mrb[40].mxu0  ;;  %v1860_v25 = vadd.f32 %v4080_v21, %v1790_v2 }
 0x797   : > { %v2628_v30 = vmax.f32 %v2612_v29, 0.0  ;;  %v2600_v31 = vmul.f32 %v4033_v61, %v2492_v19  ;;  %v2602_v24 = vmul.f32 %v4051_v7, %v2581_v5  ;;  %v2494_v32 = vpop.f32.mrb[39].mxu1  ;;  %v2583_v27 = vpop.f32.mrb[41].mxu0  ;;  %v1915_v61 = vadd.f32 %v4090_v20, %v1795_v35 }
 0x798   : > { %v2601_v18 = vmul.f32 %v4030_v8, %v2494_v32  ;;  %v2603_v34 = vmul.f32 %v4047_v4, %v2583_v27  ;;  %v1862_v7 = vadd.f32 %v4082_v22, %v1795_v35  ;;  %v2627_v4 = vmax.f32 %v4151_v55, 0.0 }
 0x799   : > { %2642 = vst.msk [vmem:[%s4160_s20 + $0x8] sm:$0xff] %vm2640_vm3, %v2628_v30  ;;  %v2616_v36 = vadd.f32 %v2600_v31, %v1858_v47  ;;  %v2618_v37 = vadd.f32 %v2602_v24, %v1911_v0  ;;  %2721 = vrot.lane.b32.xlu0 %v2626_v10, %s3261_s21  ;;  %2655 = vrot.lane.b32.xlu1 %v2625_v9, %s3260_s27  ;;  %v2630_v53 = vmax.f32 %v2614_v51, 0.0 }
 0x79a   : > { %v2617_v21 = vadd.f32 %v2601_v18, %v1860_v25  ;;  %v2619_v26 = vadd.f32 %v2603_v34, %v1913_v33  ;;  %v2498_v8 = vpop.f32.mrb[40].mxu1  ;;  %v2587_v40 = vpop.f32.mrb[42].mxu0  ;;  %v1864_v20 = vadd.f32 %v4084_v23, %v1795_v35 }
 0x79b   : > { %v2632_v38 = vmax.f32 %v2616_v36, 0.0  ;;  %v2604_v39 = vmul.f32 %v4045_v3, %v2498_v8  ;;  %v2606_v41 = vmul.f32 %v4067_v14, %v2587_v40  ;;  %v2500_v43 = vpop.f32.mrb[41].mxu1  ;;  %v2589_v44 = vpop.f32.mrb[43].mxu0  ;;  %v2634_v23 = vmax.f32 %v2618_v37, 0.0 }
 0x79c   : > { %v2605_v22 = vmul.f32 %v4037_v63, %v2500_v43  ;;  %v2607_v48 = vmul.f32 %v4056_v11, %v2589_v44  ;;  %v2629_v63 = vmax.f32 %v2613_v58, 0.0  ;;  %v2631_v11 = vmax.f32 %v2615_v13, 0.0 }
 0x79d   : > { %2643 = vst.msk [vmem:[%s4160_s20 + $0x10] sm:$0xff] %vm2640_vm3, %v2632_v38  ;;  %v2620_v49 = vadd.f32 %v2604_v39, %v1862_v7  ;;  %v2622_v50 = vadd.f32 %v2606_v41, %v1915_v61  ;;  %2687 = vrot.lane.b32.xlu0 %v2625_v9, %s3259_s3  ;;  %2723 = vrot.lane.b32.xlu1 %v2627_v4, %s3261_s21  ;;  %v2633_v28 = vmax.f32 %v2617_v21, 0.0  ;;  %v2635_v54 = vmax.f32 %v2619_v26, 0.0 }
 0x79e   : > { %v2621_v3 = vadd.f32 %v2605_v22, %v1864_v20  ;;  %v2623_v14 = vadd.f32 %v2607_v48, %v1917_v46 }
 0x79f   : > { %v2636_v15 = vmax.f32 %v2620_v49, 0.0  ;;  %v2638_v6 = vmax.f32 %v2622_v50, 0.0 }
 0x7a0   : > { %v2637_v45 = vmax.f32 %v2621_v3, 0.0  ;;  %v2639_v55 = vmax.f32 %v2623_v14, 0.0 }
 0x7a1   : > { %2644 = vst.msk [vmem:[%s4160_s20 + $0x18] sm:$0xff] %vm2640_vm3, %v2636_v15  ;;  %2693 = vrot.lane.b32.xlu1 %v2630_v53, %s3259_s3  ;;  %2657 = vrot.lane.b32.xlu0 %v2628_v30, %s3260_s27 }
 0x7a5   : > { %2659 = vrot.lane.b32.xlu1 %v2629_v63, %s3260_s27  ;;  %2725 = vrot.lane.b32.xlu0 %v2630_v53, %s3261_s21 }
 0x7a9   : > { %2727 = vrot.lane.b32.xlu1 %v2631_v11, %s3261_s21  ;;  %2691 = vrot.lane.b32.xlu0 %v2629_v63, %s3259_s3 }
 0x7ad   : > { %2697 = vrot.lane.b32.xlu1 %v2634_v23, %s3259_s3  ;;  %2661 = vrot.lane.b32.xlu0 %v2632_v38, %s3260_s27 }
 0x7b1   : > { %2663 = vrot.lane.b32.xlu1 %v2633_v28, %s3260_s27  ;;  %2729 = vrot.lane.b32.xlu0 %v2634_v23, %s3261_s21 }
 0x7b5   : > { %2731 = vrot.lane.b32.xlu1 %v2635_v54, %s3261_s21  ;;  %2695 = vrot.lane.b32.xlu0 %v2633_v28, %s3259_s3 }
 0x7b9   : > { %2701 = vrot.lane.b32.xlu1 %v2638_v6, %s3259_s3  ;;  %2665 = vrot.lane.b32.xlu0 %v2636_v15, %s3260_s27 }
 0x7bd   : > { %2667 = vrot.lane.b32.xlu1 %v2637_v45, %s3260_s27  ;;  %2699 = vrot.lane.b32.xlu0 %v2637_v45, %s3259_s3  ;;  %s3262_s3 = smov [#allocation5]  }
 0x7be   : > { %s3186_s27 = sshll.u32 %s3262_s3, 4  ;;  %s3187_s27 = int_to_ptr.vmem [resolvable:$false] %s3186_s27 }
 0x7bf   : > { %p3189_p0 = scmp.lt.s32.totalorder %s4252_s18, %s3187_s27 }
 0x7c1   : > { %2735 = vrot.lane.b32.xlu1 %v2639_v55, %s3261_s21  ;;  %2733 = vrot.lane.b32.xlu0 %v2638_v6, %s3261_s21  ;;  %s3188_s21 = scalar_lea.vmem %s3187_s27, 4096 }
 0x7c2   : > { %p3190_p1 = scmp.lt.s32.totalorder %s3188_s21, %s3182_s2 }
 0x7c4   : > { %p3191_p2 = por %p3190_p1, %p3189_p0 }
 0x7c6   : > { %p3192_p3 = pnand %p3191_p2, %p3185_p13 }
 0x807   : > { %v2654_v56 = vpop.permute.xlu0 %2653  ;;  %v2690_v16 = vpop.permute.xlu1 %2689 }
 0x80b   : > { %v2722_v57 = vpop.permute.xlu0 %2721  ;;  %v2656_v10 = vpop.permute.xlu1 %2655 }
 0x80c   : > { %v2670_v42 = vsel %vm2669_vm4, %v2654_v56, %v2656_v10 }
 0x80d   : > { %2889 = vst.msk [vmem:[%s4160_s20 + $0x20] sm:$0xff] %vm2640_vm3, %v2670_v42 }
 0x80f   : > { %v2688_v52 = vpop.permute.xlu0 %2687  ;;  %v2724_v59 = vpop.permute.xlu1 %2723 }
 0x810   : > { %v2704_v12 = vsel %vm2703_vm5, %v2688_v52, %v2690_v16  ;;  %v2738_v60 = vsel %vm2737_vm6, %v2722_v57, %v2724_v59 }
 0x811   : > { %2893 = vst.msk [vmem:[%s4160_s20 + $0x40] sm:$0xff] %vm2640_vm3, %v2704_v12  ;;  %2897 = vst.msk [vmem:[%s4160_s20 + $0x60] sm:$0xff] %vm2640_vm3, %v2738_v60 }
 0x813   : > { %v2658_v17 = vpop.permute.xlu0 %2657  ;;  %v2694_v62 = vpop.permute.xlu1 %2693 }
 0x817   : > { %v2726_v1 = vpop.permute.xlu0 %2725  ;;  %v2660_v2 = vpop.permute.xlu1 %2659 }
 0x818   : > { %v2671_v29 = vsel %vm2669_vm4, %v2658_v17, %v2660_v2 }
 0x819   : > { %2890 = vst.msk [vmem:[%s4160_s20 + $0x28] sm:$0xff] %vm2640_vm3, %v2671_v29 }
 0x81b   : > { %v2692_v51 = vpop.permute.xlu0 %2691  ;;  %v2728_v0 = vpop.permute.xlu1 %2727 }
 0x81c   : > { %v2705_v47 = vsel %vm2703_vm5, %v2692_v51, %v2694_v62  ;;  %v2739_v58 = vsel %vm2737_vm6, %v2726_v1, %v2728_v0 }
 0x81d   : > { %2894 = vst.msk [vmem:[%s4160_s20 + $0x48] sm:$0xff] %vm2640_vm3, %v2705_v47  ;;  %2898 = vst.msk [vmem:[%s4160_s20 + $0x68] sm:$0xff] %vm2640_vm3, %v2739_v58 }
 0x81f   : > { %v2662_v13 = vpop.permute.xlu0 %2661  ;;  %v2698_v19 = vpop.permute.xlu1 %2697 }
 0x823   : > { %v2730_v5 = vpop.permute.xlu0 %2729  ;;  %v2664_v9 = vpop.permute.xlu1 %2663 }
 0x824   : > { %v2672_v30 = vsel %vm2669_vm4, %v2662_v13, %v2664_v9 }
 0x825   : > { %2891 = vst.msk [vmem:[%s4160_s20 + $0x30] sm:$0xff] %vm2640_vm3, %v2672_v30 }
 0x827   : > { %v2696_v31 = vpop.permute.xlu0 %2695  ;;  %v2732_v24 = vpop.permute.xlu1 %2731 }
 0x828   : > { %v2706_v32 = vsel %vm2703_vm5, %v2696_v31, %v2698_v19  ;;  %v2740_v27 = vsel %vm2737_vm6, %v2730_v5, %v2732_v24 }
 0x829   : > { %2895 = vst.msk [vmem:[%s4160_s20 + $0x50] sm:$0xff] %vm2640_vm3, %v2706_v32  ;;  %2899 = vst.msk [vmem:[%s4160_s20 + $0x70] sm:$0xff] %vm2640_vm3, %v2740_v27 }
 0x82b   : > { %v2666_v33 = vpop.permute.xlu0 %2665  ;;  %v2702_v25 = vpop.permute.xlu1 %2701 }
 0x82f   : > { %v2700_v18 = vpop.permute.xlu0 %2699  ;;  %v2668_v34 = vpop.permute.xlu1 %2667 }
 0x830   : > { %v2707_v35 = vsel %vm2703_vm5, %v2700_v18, %v2702_v25  ;;  %v2673_v36 = vsel %vm2669_vm4, %v2666_v33, %v2668_v34 }
 0x831   : > { %2896 = vst.msk [vmem:[%s4160_s20 + $0x58] sm:$0xff] %vm2640_vm3, %v2707_v35  ;;  %2892 = vst.msk [vmem:[%s4160_s20 + $0x38] sm:$0xff] %vm2640_vm3, %v2673_v36 }
 0x833   : > { %v2734_v37 = vpop.permute.xlu0 %2733  ;;  %v2736_v61 = vpop.permute.xlu1 %2735 }
 0x834   : > { %v2741_v7 = vsel %vm2737_vm6, %v2734_v37, %v2736_v61 }
 0x835   : > { %2900 = vst.msk [vmem:[%s4160_s20 + $0x78] sm:$0xff] %vm2640_vm3, %v2741_v7 }
 0x836   : > { %3195 = shalt.err (!%p3192_p3)
}
 0x837   : > { %s3196_s1 = scalar_lea.hbm %s4250_s0, 2048  ;;  %s3200_s25 = scalar_lea.hbm %s4314_s14, 4096 }
 0x838   : > { %p3197_p4 = scmp.ne.s32.totalorder %s4250_s0, %s3196_s1  ;;  %p3201_p9 = scmp.lt.u32.totalorder %s4250_s0, %s4314_s14 }
 0x839   : > { %p3202_p10 = scmp.lt.u32.totalorder %s3200_s25, %s3196_s1  ;;  %p3204_p12 = scmp.lt.u32.totalorder %s3196_s1, %s4250_s0 }
 0x83a   : > { %p3198_p7 = pnand %p3197_p4, %p3378_p5 }
 0x83b   : > { %p3203_p11 = por %p3202_p10, %p3201_p9 }
 0x83c   : > { %p3199_p8 = pneg %p3198_p7 }
 0x83d   : > { %p3205_p13 = por %p3204_p12, %p3203_p11 }
 0x83f   : > { %p3206_p0 = pnand %p3205_p13, %p3199_p8 }
 0x841   : > { %3209 = shalt.err (!%p3206_p0)
}
 0x842   : > { %s3263_s2 = smov 128   ;;  %s3264_s27 = smov 8  }
 0x843   : > { %3080 = dma.vmem_to_hbm [thread:$0]  (%p3378_p5), %s4252_s18, 2048, %s4250_s0, %s4259_s17, %s3263_s2, %s3263_s2, %s3264_s27  }
 0x844 PF: > { %p3086_p1 = scmp.ge.s32.totalorder %s3244_s16, 2  ;;  %s2781_s21 = sand.u32 1, %s3232_s29  }
 0x845   : > { %s2782_s1 = scalar_lea.sflag [#allocation6], %s2781_s21 }
 0x846   : > { %p3083_p2 = pnand %p3086_p1, %p3382_p6 }
 0x848   : > { %3227 = dma.done.wait (!%p3083_p2), %s2782_s1, 2048  }
 0x849   : > { %3229 = vsyncadd (!%p3083_p2), %s2782_s1, 4294965248  ;;  %p24_p3 = scmp.ge.s32.totalorder %s3365_s19, 4   ;;  %s4349_s29 = smov %s3236_s30 }
 0x84a   : > { %s4350_s30 = smov %s3240_s15  ;;  %s4351_s15 = smov %s3376_s22 }
 0x84b   : > { %s4352_s16 = smov %s3365_s19  ;;  %26 = sbr.rel (!%p24_p3) target bundleno = 8 (0x8), region = 114 }
 0x852   :  { %2787 = vsyncpa [#allocation6], 1 }
 0x853   :  { %2789 = vsyncpa [#allocation6 + $0x1], 1 }

</bundles_post_ra>
